<compile_context>
chip_gen: v6e
topology: v6e:2x2x1
jax: 0.10.0
libtpu: 0.0.40
codegen_flags: <defaults>
</compile_context>

<pallas_src>
import numpy as np
import jax
import jax.numpy as jnp
from jax.experimental import pallas as pl
from jax.experimental.pallas import tpu as pltpu

a0 = 0.5291772

# ---------------- static configuration (stands in for the module globals) ----
NUMBERS = (8, 1, 1)                 # H2O
BK_TABLE = {1: 2, 8: 4}             # synthetic basis size per element Z
B_K = [BK_TABLE[z] for z in NUMBERS]
B = sum(B_K)                        # total basis size (8)
BMAX = max(B_K)                     # 4
BB = BMAX * BMAX                    # 16
N_ATOMS = len(NUMBERS)
N_ELEC = sum(NUMBERS)
N_OCC = N_ELEC // 2
N_ATOM_BASIS = 32
N_SCHNORB = 32
BATCH = 2

D3A = 3 * N_ATOM_BASIS              # 96  (per-atom mu features, d-major)
D3S = 3 * N_SCHNORB                 # 96  (per-atom x features, d-major)
FEAT = N_ATOMS * D3A                # 288 input lanes per molecule
OFF_PAIRS = [(k, l) for k in range(N_ATOMS) for l in range(k)]   # k > l
N_PAIRS = len(OFF_PAIRS)
N_PAT = N_ATOMS + N_PAIRS           # 6 patterns: on(k) then off pairs (k,l)
PFEAT = N_PAT * D3S                 # 576 p-lanes
OUT_LANES = ((B * B + 127) // 128) * 128   # pad B*B=64 up to 128 lanes

# column permutation turning (a*BMAX+b) into (b*BMAX+a)  (Bmax-block transpose)
_PERM_T = np.array([(m % BMAX) * BMAX + (m // BMAX) for m in range(BB)], dtype=np.int32)
_OFFSETS = np.concatenate([[0], np.cumsum(B_K)]).astype(int)

# pattern r -> source atom k, and l-selector (None means "sum over all atoms")
_PAT_K = list(range(N_ATOMS)) + [k for (k, l) in OFF_PAIRS]
_PAT_L = [None] * N_ATOMS + [l for (k, l) in OFF_PAIRS]


def _build_scatter():
    """G[r]: (BB, OUT_LANES) 0/1 map from pattern r's Bmax x Bmax projection
    into the row-major flattened B x B delta_F (incl. the block transposes)."""
    G = np.zeros((N_PAT, BB, OUT_LANES), np.float32)
    for K in range(N_ATOMS):
        for L in range(N_ATOMS):
            if K == L:                               # symmetrized diagonal block
                r = K
                for a in range(B_K[K]):
                    for b in range(B_K[K]):
                        m = (_OFFSETS[K] + a) * B + (_OFFSETS[K] + b)
                        G[r, a * BMAX + b, m] = 1.0
            elif K > L:                              # block (K, L) of F_off
                r = N_ATOMS + OFF_PAIRS.index((K, L))
                for a in range(B_K[K]):
                    for b in range(B_K[L]):
                        m = (_OFFSETS[K] + a) * B + (_OFFSETS[L] + b)
                        G[r, a * BMAX + b, m] = 1.0
            else:                                    # K < L: transposed block (L, K)
                r = N_ATOMS + OFF_PAIRS.index((L, K))
                for a in range(B_K[K]):
                    for b in range(B_K[L]):
                        m = (_OFFSETS[K] + a) * B + (_OFFSETS[L] + b)
                        G[r, b * BMAX + a, m] = 1.0
    return G


_SCATTER_NP = _build_scatter()


# ---------------- the single fused Pallas kernel (one grid step) -------------
def _xpainn_fused_kernel(mu_ref, wa_ref, ba_ref, wb_ref, bb_ref,
                         wd_ref, bd_ref, h_ref, foff_ref, f_ref):
    mu = mu_ref[...]                                              # (nb, FEAT)
    # k-side and l-side selections (transfer Linear folded into wa/wb):
    #   a_sel[:, r*96:(r+1)*96] = x_{k(r)} ;  b_sel = x_{l(r)}  or  sum_l x_l
    a_sel = jnp.dot(mu, wa_ref[...], preferred_element_type=jnp.float32) + ba_ref[...]
    b_sel = jnp.dot(mu, wb_ref[...], preferred_element_type=jnp.float32) + bb_ref[...]
    p_all = a_sel * b_sel                                         # (nb, PFEAT)
    # projection + symmetrization + block scatter + mask*1e-4 folded into wd/bd
    delta = jnp.dot(p_all, wd_ref[...], preferred_element_type=jnp.float32) + bd_ref[...]
    keep = jnp.abs(h_ref[...]) > 1e-7                             # (nb, OUT_LANES)
    f_ref[...] = jnp.where(keep, delta, 0.0) + foff_ref[...]


def _fused_fock(mu_flat, wa, ba, wb, bb, wd, bd, h_pad, foff):
    nb = mu_flat.shape[0]
    flops = 2 * (2 * nb * FEAT * PFEAT) + 2 * nb * PFEAT * OUT_LANES + 6 * nb * OUT_LANES
    bytes_accessed = 4 * (mu_flat.size + wa.size + ba.size + wb.size + bb.size
                          + wd.size + bd.size + h_pad.size + foff.size + nb * OUT_LANES)
    vmem = pl.BlockSpec(memory_space=pltpu.MemorySpace.VMEM)      # whole-array blocks
    return pl.pallas_call(
        _xpainn_fused_kernel,
        out_shape=jax.ShapeDtypeStruct((nb, OUT_LANES), jnp.float32),
        in_specs=[vmem] * 9,
        out_specs=pl.BlockSpec(memory_space=pltpu.MemorySpace.VMEM),
        cost_estimate=pl.CostEstimate(flops=flops, transcendentals=0,
                                      bytes_accessed=bytes_accessed),
    )(mu_flat, wa, ba, wb, bb, wd, bd, h_pad, foff)


# ---------------- constant-weight folding (pure parameter plumbing) ----------
def _fold_params(params):
    w_t, b_t = params["W_t"], params["b_t"]
    w_bd = jax.scipy.linalg.block_diag(w_t, w_t, w_t)             # (D3A, D3S)
    b_t3 = jnp.tile(b_t, (1, 3))                                  # (1, D3S)
    z_bd = jnp.zeros_like(w_bd)

    wa_cols, wb_cols, ba_parts, bb_parts = [], [], [], []
    for r in range(N_PAT):
        k = _PAT_K[r]
        wa_cols.append(jnp.concatenate(
            [w_bd if a == k else z_bd for a in range(N_ATOMS)], axis=0))
        ba_parts.append(b_t3)
        if _PAT_L[r] is None:          # on-pattern: sum over ALL l (incl. l == k)
            wb_cols.append(jnp.concatenate([w_bd] * N_ATOMS, axis=0))
            bb_parts.append(N_ATOMS * b_t3)
        else:
            l = _PAT_L[r]
            wb_cols.append(jnp.concatenate(
                [w_bd if a == l else z_bd for a in range(N_ATOMS)], axis=0))
            bb_parts.append(b_t3)
    wa = jnp.concatenate(wa_cols, axis=1)                         # (FEAT, PFEAT)
    wb = jnp.concatenate(wb_cols, axis=1)                         # (FEAT, PFEAT)
    ba = jnp.concatenate(ba_parts, axis=1)                        # (1, PFEAT)
    bb = jnp.concatenate(bb_parts, axis=1)                        # (1, PFEAT)

    perm = _PERM_T
    w_on_sym = 0.5 * (params["W_on"] + params["W_on"][:, perm])   # folds 0.5*(F+F^T)
    b_on_sym = 0.5 * (params["b_on"] + params["b_on"][:, perm])
    w_off, b_off = params["W_off"], params["b_off"]
    g = jnp.asarray(_SCATTER_NP)                                  # (N_PAT, BB, OUT_LANES)

    wd_rows = []
    bd = jnp.zeros((1, OUT_LANES), jnp.float32)
    for r in range(N_PAT):
        if r < N_ATOMS:
            wd_rows.append(jnp.dot(w_on_sym, g[r]))
            bd = bd + jnp.dot(N_ATOMS * b_on_sym, g[r])           # bias summed over l
        else:
            wd_rows.append(jnp.dot(w_off, g[r]))
            bd = bd + jnp.dot(b_off, g[r])
    wd = jnp.concatenate(wd_rows, axis=0)                         # (PFEAT, OUT_LANES)

    # fold the constant mask and the fixed 1e-4 scale into the projection
    scale = jnp.zeros((OUT_LANES,), jnp.float32).at[:B * B].set(
        1e-4 * params["mask"].reshape(B * B))
    wd = wd * scale[None, :]
    bd = bd * scale[None, :]

    foff = jnp.zeros((1, OUT_LANES), jnp.float32).at[:, :B * B].set(
        params["F_offset"].reshape(1, B * B))
    return wa, ba, wb, bb, wd, bd, foff


# ---------------- full forward pass -------------------------------------------
def xpainn_forward(params, positions, h_new):
    nb = positions.shape[0]

    # TODO(synk): deterministic equivariant stub replacing the schnetpack PaiNN
    # vector_representation (batch, atoms, 3, n_atom_basis); d-major layout.
    sum_disp = N_ATOMS * positions - jnp.sum(positions, axis=1, keepdims=True)  # (nb, A, 3)
    mu = sum_disp[..., None] * params["painn_stub_w"][None, None, None, :]      # (nb, A, 3, nAB)
    mu_flat = mu.reshape(nb, FEAT)                                              # (nb, 288)

    wa, ba, wb, bb, wd, bd, foff = _fold_params(params)

    h_flat = h_new.reshape(nb, B * B)
    h_pad = jnp.zeros((nb, OUT_LANES), jnp.float32).at[:, :B * B].set(h_flat)

    f_pad = _fused_fock(mu_flat, wa, ba, wb, bb, wd, bd, h_pad, foff)           # (nb, 128)
    f_mat = f_pad[:, :B * B].reshape(nb, B, B)

    # TODO(synk): eigendecomposition has no Pallas equivalent; done in XLA.
    e, u = jnp.linalg.eigh(f_mat)
    u_occ = u[:, :, :N_OCC]
    hu = jnp.einsum("npq,nqj->npj", h_new, u_occ)
    tr = jnp.einsum("npj,npj->n", u_occ, hu)
    e_e = jnp.sum(e[:, :N_OCC], axis=1) + tr

    # nuclear repulsion (glue, tiny)
    nuc_terms = []
    for k in range(N_ATOMS):
        for l in range(k):
            d = jnp.linalg.norm(positions[:, k] - positions[:, l], axis=1)
            nuc_terms.append(NUMBERS[k] * NUMBERS[l] / d * a0)
    nuc = jnp.sum(jnp.stack(nuc_terms, axis=-1), axis=-1)

    e_total = e_e + nuc + params["delta_E"]
    return f_mat, e, e_total


# ---------------- main ---------------------------------------------------------
if __name__ == "__main__":
    key = jax.random.PRNGKey(0)
    ks = jax.random.split(key, 10)

    params = {
        "painn_stub_w": 0.1 * jax.random.normal(ks[0], (N_ATOM_BASIS,), jnp.float32),
        # nn.Linear(n_atom_basis, n_SchNOrb): stored transposed (in, out)
        "W_t": 0.1 * jax.random.normal(ks[1], (N_ATOM_BASIS, N_SCHNORB), jnp.float32),
        "b_t": 0.1 * jax.random.normal(ks[2], (1, N_SCHNORB), jnp.float32),
        # nn.Linear(3*n_SchNOrb, Bmax**2)
        "W_on": 0.1 * jax.random.normal(ks[3], (3 * N_SCHNORB, BB), jnp.float32),
        "b_on": 0.1 * jax.random.normal(ks[4], (1, BB), jnp.float32),
        "W_off": 0.1 * jax.random.normal(ks[5], (3 * N_SCHNORB, BB), jnp.float32),
        "b_off": 0.1 * jax.random.normal(ks[6], (1, BB), jnp.float32),
        "mask": jnp.ones((B, B), jnp.float32),
        "delta_E": jnp.float32(0.0),
    }
    foff_raw = jax.random.normal(ks[7], (B, B), jnp.float32)
    params["F_offset"] = 0.5 * (foff_raw + foff_raw.T)

    # atom positions (batch, n_atoms, 3); offset each atom so distances > 0
    positions = (
        0.1 * jax.random.normal(ks[8], (BATCH, N_ATOMS, 3), jnp.float32)
        + 1.5 * jnp.arange(N_ATOMS, dtype=jnp.float32)[None, :, None]
    )
    # Löwdin-orthonormalized one-electron matrix, symmetric (h_available path)
    h_raw = jax.random.normal(ks[9], (BATCH, B, B), jnp.float32)
    h_new = 0.5 * (h_raw + jnp.swapaxes(h_raw, 1, 2))

    fwd = jax.jit(xpainn_forward)
    F, e, E = fwd(params, positions, h_new)
    jax.block_until_ready((F, e, E))
    assert F.shape == (BATCH, B, B) and e.shape == (BATCH, B) and E.shape == (BATCH,)
    print("KERNEL_OK")
</pallas_src>

<mosaic_0001>
module attributes {stable_mosaic.version = 11 : i64} {
  func.func @_xpainn_fused_kernel(%arg0: memref<2x288xf32, #tpu.memory_space<vmem>>, %arg1: memref<288x576xf32, #tpu.memory_space<vmem>>, %arg2: memref<1x576xf32, #tpu.memory_space<vmem>>, %arg3: memref<288x576xf32, #tpu.memory_space<vmem>>, %arg4: memref<1x576xf32, #tpu.memory_space<vmem>>, %arg5: memref<576x128xf32, #tpu.memory_space<vmem>>, %arg6: memref<1x128xf32, #tpu.memory_space<vmem>>, %arg7: memref<2x128xf32, #tpu.memory_space<vmem>>, %arg8: memref<1x128xf32, #tpu.memory_space<vmem>>, %arg9: memref<2x128xf32, #tpu.memory_space<vmem>>) attributes {dimension_semantics = [], scalar_prefetch = 0 : i64, scratch_operands = 0 : i64, tpu.core_type = #tpu.core_type<tc>} {
    %c0 = arith.constant 0 : index
    %c0_0 = arith.constant 0 : index
    %0 = vector.load %arg0[%c0, %c0_0] : memref<2x288xf32, #tpu.memory_space<vmem>>, vector<2x288xf32>
    %c0_1 = arith.constant 0 : index
    %c0_2 = arith.constant 0 : index
    %1 = vector.load %arg1[%c0_1, %c0_2] : memref<288x576xf32, #tpu.memory_space<vmem>>, vector<288x576xf32>
    %cst = arith.constant dense<0.000000e+00> : vector<2x576xf32>
    %2 = tpu.matmul %0, %1, %cst {dimension_numbers = #tpu.dot_dimension_numbers<[1], [0], [0], [1], [0, 0, 1, 1], [], []>} : vector<2x288xf32>, vector<288x576xf32>, vector<2x576xf32> -> vector<2x576xf32>
    %c0_3 = arith.constant 0 : index
    %c0_4 = arith.constant 0 : index
    %3 = vector.load %arg2[%c0_3, %c0_4] : memref<1x576xf32, #tpu.memory_space<vmem>>, vector<1x576xf32>
    %4 = vector.broadcast %3 : vector<1x576xf32> to vector<2x576xf32>
    %5 = arith.addf %2, %4 : vector<2x576xf32>
    %c0_5 = arith.constant 0 : index
    %c0_6 = arith.constant 0 : index
    %6 = vector.load %arg3[%c0_5, %c0_6] : memref<288x576xf32, #tpu.memory_space<vmem>>, vector<288x576xf32>
    %cst_7 = arith.constant dense<0.000000e+00> : vector<2x576xf32>
    %7 = tpu.matmul %0, %6, %cst_7 {dimension_numbers = #tpu.dot_dimension_numbers<[1], [0], [0], [1], [0, 0, 1, 1], [], []>} : vector<2x288xf32>, vector<288x576xf32>, vector<2x576xf32> -> vector<2x576xf32>
    %c0_8 = arith.constant 0 : index
    %c0_9 = arith.constant 0 : index
    %8 = vector.load %arg4[%c0_8, %c0_9] : memref<1x576xf32, #tpu.memory_space<vmem>>, vector<1x576xf32>
    %9 = vector.broadcast %8 : vector<1x576xf32> to vector<2x576xf32>
    %10 = arith.addf %7, %9 : vector<2x576xf32>
    %11 = arith.mulf %5, %10 : vector<2x576xf32>
    %c0_10 = arith.constant 0 : index
    %c0_11 = arith.constant 0 : index
    %12 = vector.load %arg5[%c0_10, %c0_11] : memref<576x128xf32, #tpu.memory_space<vmem>>, vector<576x128xf32>
    %cst_12 = arith.constant dense<0.000000e+00> : vector<2x128xf32>
    %13 = tpu.matmul %11, %12, %cst_12 {dimension_numbers = #tpu.dot_dimension_numbers<[1], [0], [0], [1], [0, 0, 1, 1], [], []>} : vector<2x576xf32>, vector<576x128xf32>, vector<2x128xf32> -> vector<2x128xf32>
    %c0_13 = arith.constant 0 : index
    %c0_14 = arith.constant 0 : index
    %14 = vector.load %arg6[%c0_13, %c0_14] : memref<1x128xf32, #tpu.memory_space<vmem>>, vector<1x128xf32>
    %15 = vector.broadcast %14 : vector<1x128xf32> to vector<2x128xf32>
    %16 = arith.addf %13, %15 : vector<2x128xf32>
    %c0_15 = arith.constant 0 : index
    %c0_16 = arith.constant 0 : index
    %17 = vector.load %arg7[%c0_15, %c0_16] : memref<2x128xf32, #tpu.memory_space<vmem>>, vector<2x128xf32>
    %18 = math.absf %17 : vector<2x128xf32>
    %cst_17 = arith.constant 1.000000e-07 : f32
    %19 = vector.broadcast %cst_17 : f32 to vector<2x128xf32>
    %20 = arith.cmpf ogt, %18, %19 : vector<2x128xf32>
    %cst_18 = arith.constant 0.000000e+00 : f32
    %21 = vector.broadcast %cst_18 : f32 to vector<2x128xf32>
    %22 = arith.select %20, %16, %21 : vector<2x128xi1>, vector<2x128xf32>
    %c0_19 = arith.constant 0 : index
    %c0_20 = arith.constant 0 : index
    %23 = vector.load %arg8[%c0_19, %c0_20] : memref<1x128xf32, #tpu.memory_space<vmem>>, vector<1x128xf32>
    %24 = vector.broadcast %23 : vector<1x128xf32> to vector<2x128xf32>
    %25 = arith.addf %22, %24 : vector<2x128xf32>
    %c0_21 = arith.constant 0 : index
    %c0_22 = arith.constant 0 : index
    %26 = vector.load %arg9[%c0_21, %c0_22] : memref<2x128xf32, #tpu.memory_space<vmem>>, vector<2x128xf32>
    tpu.vector_store %arg9[%c0_21, %c0_22], %25 {strides = array<i32>} : memref<2x128xf32, #tpu.memory_space<vmem>>, vector<2x128xf32>,
    return
  }
}

</mosaic_0001>

<bundles_post_ra>
// kernel: custom-call.2
= control target key start
LH: loop header
LB: loop body
LE: loop exit
PB: predicated region body
PF: predicated region fallthrough
CT: control target
= control target key end

     0   :  { %s1740_s30 = smov 0   ;;  %s1742_s10 = smov 0   ;;  %s2067_s0 = inlined_call_operand.vmem [shape: f32[2,4,4], index: 0, kind: input, shape index: {}]   ;;  %s2068_s1 = inlined_call_operand.vmem [shape: f32[2,4,4], index: 1, kind: input, shape index: {}]   ;;  %s2069_s2 = inlined_call_operand.vmem [shape: f32[2,4,4], index: 2, kind: input, shape index: {}]   ;;  %s2070_s3 = inlined_call_operand.vmem [shape: f32[2,4,4], index: 3, kind: input, shape index: {}]   ;;  %s2071_s4 = inlined_call_operand.vmem [shape: f32[2,4], index: 4, kind: output, shape index: {0}]   ;;  %s2072_s5 = inlined_call_operand.vmem [shape: f32[2,4], index: 5, kind: output, shape index: {1}]   ;;  %s2073_s6 = inlined_call_operand.vmem [shape: f32[2,4,4], index: 6, kind: output, shape index: {2}]   ;;  %s2074_s7 = inlined_call_operand.vmem [shape: f32[2,4,4], index: 7, kind: output, shape index: {3}]   ;;  %s2075_s8 = inlined_call_operand.vmem [shape: f32[2,4,4], index: 8, kind: output, shape index: {4}]   ;;  %s2076_s9 = inlined_call_operand.vmem [shape: f32[2,4,4], index: 9, kind: output, shape index: {5}]  }
   0x1   :  { %s1744_s11 = smov 0  }
   0x2 LB: > { %s1756_s12 = sadd.s32 4294967295, %s1677_s11   ;;  %s1759_s13 = sadd.s32 1, %s1677_s11   ;;  %s1677_s11 = sphi %s1744_s11, %s2095_s11   ;;  %s1673_s10 = sphi %s1742_s10, %s2094_s10   ;;  %s1669_s30 = sphi %s1740_s30, %s2093_s30  }
   0x3   : > { %s20_s14 = sshrl.u32 %s1677_s11, 3  ;;  %s21_s15 = sshrl.u32 %s1759_s13, 3 }
   0x4   : > { %s22_s16 = ssub.s32 %s20_s14, %s21_s15  ;;  %s25_s17 = sadd.s32 1, %s1673_s10 }
   0x5   : > { %p23_p0 = scmp.eq.s32.totalorder %s22_s16, 0  ;;  %p35_p1 = scmp.ne.s32.totalorder %s1673_s10, %s1669_s30 }
   0x6   : > { %p36_p2 = scmp.eq.s32.totalorder %s1756_s12, 1  ;;  %p1538_p4 = scmp.ge.s32.totalorder %s1677_s11, 2 }
   0x7   : > { %s1768_s18 = scalar_select %p23_p0, %s1673_s10, %s25_s17  }
   0x8   : > { %p1770_p3 = por %p36_p2, %p35_p1  ;;  %86 = sbr.rel (%p1538_p4) target bundleno = 18 (0x12), region = 16 }
   0x9   : > { %2077 = sst [smem:[#allocation33_spill]] %s1768_s18  ;;  %s88_s20 = sand.u32 (!%p1538_p4), 1, %s1677_s11  }
   0xa   : > { %s1540_s21 = sshll.u32 (!%p1538_p4), %s1677_s11, 2  ;;  %s1539_s22 = sshll.u32 (!%p1538_p4), %s88_s20, 2 }
   0xb   : > { %s92_s25 = scalar_lea.vmem (!%p1538_p4), %s2067_s0, %s1540_s21  ;;  %s90_s26 = scalar_lea.vmem (!%p1538_p4), [#allocation1], %s1539_s22 }
   0xc   : > { %s131_s29 = scalar_lea.vmem (!%p1538_p4), %s2068_s1, %s1540_s21  ;;  %s170_s16 = scalar_lea.vmem (!%p1538_p4), %s2069_s2, %s1540_s21 }
   0xd   : > { %v109_v0 = vld [vmem:[%s92_s25] sm:$0xf]  ;;  %s129_s17 = scalar_lea.vmem [#allocation3], %s1539_s22  ;;  %s209_s23 = scalar_lea.vmem %s2070_s3, %s1540_s21 }
   0xe   : > { %110 = vst [vmem:[%s90_s26] sm:$0xf] %v109_v0  ;;  %v148_v1 = vld [vmem:[%s131_s29] sm:$0xf]  ;;  %s168_s24 = scalar_lea.vmem [#allocation5], %s1539_s22  ;;  %s207_s25 = scalar_lea.vmem [#allocation7], %s1539_s22 }
   0xf   : > { %149 = vst [vmem:[%s129_s17] sm:$0xf] %v148_v1  ;;  %v187_v2 = vld [vmem:[%s170_s16] sm:$0xf] }
  0x10   : > { %188 = vst [vmem:[%s168_s24] sm:$0xf] %v187_v2  ;;  %v226_v3 = vld [vmem:[%s209_s23] sm:$0xf] }
  0x11   : > { %227 = vst [vmem:[%s207_s25] sm:$0xf] %v226_v3 }
  0x12 PF: > { %p1547_p5 = scmp.ge.s32.totalorder %s1677_s11, 1  ;;  %p244_p6 = scmp.lt.s32.totalorder %s1677_s11, 3 }
  0x14   : > { %p245_p7 = pnand %p1547_p5, %p244_p6 }
  0x16   : > { %248 = sbr.rel (%p245_p7) target bundleno = 994 (0x3e2), region = 140 }
  0x1b   : > { %s267_s26 = sand.u32 1, %s1756_s12   ;;  %s285_s27 = sand.u32 1, %s1669_s30   ;;  %v349_v4 = vlaneseq  ;;  %v1687_v5 = vmov 0.0  }
  0x1c   : > { %s1793_s28 = sshll.u32 %s267_s26, 2  ;;  %s1795_s18 = sshll.u32 %s285_s27, 1  ;;  %344 = vst [vmem:[#allocation12] sm:$0xff] %v1687_v5  ;;  %345 = vst [vmem:[#allocation14] sm:$0xff] %v1687_v5 }
  0x1d   : > { %346 = vst [vmem:[#allocation16] sm:$0xff] %v1687_v5  ;;  %347 = vst [vmem:[#allocation18] sm:$0xff] %v1687_v5  ;;  %v1797_v6 = vand.u32 127, %v349_v4  ;;  %v1799_v7 = vshrl.u32 %v349_v4, 7  ;;  %s269_s11 = scalar_lea.vmem [#allocation1], %s1793_s28  ;;  %s273_s30 = scalar_lea.vmem [#allocation3], %s1793_s28 }
  0x1e   : > { %v313_v8 = vld [vmem:[%s269_s11] sm:$0xf]  ;;  %v318_v9 = vld [vmem:[%s273_s30] sm:$0xf]  ;;  %s277_s21 = scalar_lea.vmem [#allocation5], %s1793_s28  ;;  %s281_s22 = scalar_lea.vmem [#allocation7], %s1793_s28 }
  0x1f   : > { %314 = vst [vmem:[#allocation0] sm:$0xf] %v313_v8  ;;  %319 = vst [vmem:[#allocation2] sm:$0xf] %v318_v9  ;;  %v323_v10 = vld [vmem:[%s277_s21] sm:$0xf]  ;;  %v351_v6 = vmov %v1797_v6  ;;  %v354_v7 = vmov %v1799_v7 }
  0x20   : > { %v328_v11 = vld [vmem:[%s281_s22] sm:$0xf]  ;;  %324 = vst [vmem:[#allocation4] sm:$0xf] %v323_v10  ;;  %v364_v6 = vmov %v1797_v6  ;;  %v367_v7 = vmov %v1799_v7  ;;  %s332_s29 = smov [#allocation20]  ;;  %s335_s14 = smov [#allocation21]  ;;  %vm358_vm0 = vcmp.eq.s32.totalorder %v354_v7, %v351_v6 }
  0x21   : > { %329 = vst [vmem:[#allocation6] sm:$0xf] %v328_v11  ;;  %vm371_vm1 = vcmp.eq.s32.totalorder %v367_v7, %v364_v6  ;;  %s348_s15 = smov [#allocation12]  ;;  %s361_s16 = smov [#allocation18]  ;;  %vm1427_vm2 = vcmp.lt.s32.totalorder %v1797_v6, 4  ;;  %v1419_v6 = vmov %v1797_v6  ;;  %v1422_v7 = vmov %v1799_v7 }
  0x22   : > { %s338_s17 = smov [#allocation22]  ;;  %s341_s20 = smov [#allocation23]  ;;  %vm1432_vm3 = vcmp.eq.s32.totalorder %v1422_v7, %v1419_v6  ;;  %v1470_v6 = vmov %v1797_v6  ;;  %v1439_v7 = vmov %v1799_v7 }
  0x23   : > { %v355_v12 = vld [vmem:[%s348_s15] sm:$0xf]  ;;  %s1423_s30 = smov [#allocation20]  ;;  %s1440_s21 = smov [#allocation21]  ;;  %v1436_v6 = vmov %v1797_v6  ;;  %v1473_v7 = vmov %v1799_v7 }
  0x24   : > { %v368_v13 = vld [vmem:[%s361_s16] sm:$0xf]  ;;  %v359_v16 = vsel %vm358_vm0, 1.0, %v355_v12  ;;  %s1457_s22 = smov [#allocation22]  ;;  %v1453_v6 = vmov %v1797_v6  ;;  %v1456_v7 = vmov %v1799_v7  ;;  %vm1483_vm4 = vcmp.eq.s32.totalorder %v1473_v7, %v1470_v6 }
  0x25   : > { %v372_v17 = vsel %vm371_vm1, 1.0, %v368_v13  ;;  %360 = vst [vmem:[%s348_s15] sm:$0xf] %v359_v16 }
  0x26   : > { %v333_v14 = vld [vmem:[#allocation0] sm:$0xff]  ;;  %v336_v15 = vld [vmem:[#allocation2] sm:$0xff]  ;;  %373 = vst [vmem:[%s361_s16] sm:$0xf] %v372_v17 }
  0x27   : > { %334 = vst [vmem:[%s332_s29] sm:$0xff] %v333_v14  ;;  %337 = vst [vmem:[%s335_s14] sm:$0xff] %v336_v15  ;;  %v339_v18 = vld [vmem:[#allocation4] sm:$0xff]  ;;  %s1474_s29 = smov [#allocation23] }
  0x28   : > { %v342_v19 = vld [vmem:[#allocation6] sm:$0xff]  ;;  %340 = vst [vmem:[%s338_s17] sm:$0xff] %v339_v18 }
  0x29   : > { %343 = vst [vmem:[%s341_s20] sm:$0xff] %v342_v19 }
  0x2e   : > { %v1429_v20 = vld [vmem:[%s1423_s30] sm:$0xf] }
  0x2f   : > { %v1446_v21 = vld [vmem:[%s1440_s21] sm:$0xf]  ;;  %v1430_v22 = vsel %vm1427_vm2, %v1429_v20, 0.0 }
  0x30   : > { %v1447_v23 = vsel %vm1427_vm2, %v1446_v21, 0.0  ;;  %v1463_v24 = vld [vmem:[%s1457_s22] sm:$0xf]  ;;  %v1431_v26 = vmul.f32 %v1430_v22, %v1430_v22 }
  0x31   : > { %v1480_v25 = vld [vmem:[%s1474_s29] sm:$0xf]  ;;  %v1448_v27 = vmul.f32 %v1447_v23, %v1447_v23  ;;  %v1464_v28 = vsel %vm1427_vm2, %v1463_v24, 0.0 }
  0x32   : > { %v1481_v29 = vsel %vm1427_vm2, %v1480_v25, 0.0  ;;  %v1465_v30 = vmul.f32 %v1464_v28, %v1464_v28  ;;  %v1433_v33 = vsel %vm1432_vm3, 0.0, %v1431_v26 }
  0x33   : > { %v1450_v31 = vadd.f32 %v1448_v27, %v1431_v26  ;;  %v1482_v32 = vmul.f32 %v1481_v29, %v1481_v29  ;;  %v1449_v34 = vadd.f32 %v1448_v27, %v1433_v33 }
  0x35   : > { %v1467_v35 = vadd.f32 %v1465_v30, %v1450_v31  ;;  %v1466_v36 = vadd.f32 %v1465_v30, %v1449_v34  ;;  %v1484_v37 = vsel %vm1483_vm4, 0.0, %v1482_v32 }
  0x37   : > { %v1486_v38 = vadd.f32 %v1482_v32, %v1467_v35  ;;  %v1485_v39 = vadd.f32 %v1484_v37, %v1466_v36 }
  0x39   : > { %1487 = vadd.xlane.f32.xlu0 %v1486_v38 }
  0x3d   : > { %1495 = vadd.xlane.f32.xlu0 %v1485_v39 }
  0xc2   : > { %v1488_v40 = vpop.xlane.xlu0 %1487 }
  0xc3   : > { %v1489_v41 = vrot.slane %v1488_v40, 4 }
  0xc5   : > { %v1490_v42 = vadd.f32 %v1489_v41, %v1488_v40 }
  0xc6   : > { %v1496_v43 = vpop.xlane.xlu0 %1495 }
  0xc7   : > { %v1491_v44 = vrot.slane %v1490_v42, 2  ;;  %v1497_v45 = vrot.slane %v1496_v43, 4 }
  0xc9   : > { %v1498_v46 = vadd.f32 %v1497_v45, %v1496_v43  ;;  %v1492_v47 = vadd.f32 %v1491_v44, %v1490_v42 }
  0xcb   : > { %v1499_v48 = vrot.slane %v1498_v46, 2  ;;  %v1493_v50 = vrot.slane %v1492_v47, 1 }
  0xcd   : > { %v1500_v49 = vadd.f32 %v1499_v48, %v1498_v46  ;;  %v1494_v53 = vadd.f32 %v1493_v50, %v1492_v47 }
  0xcf   : > { %v1501_v51 = vrot.slane %v1500_v49, 1 }
  0xd1   : > { %v1502_v52 = vadd.f32 %v1501_v51, %v1500_v49 }
  0xd3   : > { %1588 = vpush %v1502_v52 }
  0xd4   : > { %1590 = vpush %v1494_v53 }
 0x104   : > { %s1589_s14 = spop %1588 }
 0x105   : > { %s1591_s15 = spop %1590 }
 0x106   : > { %s1505_s16 = smul.f32 1e-10, %s1591_s15 }
 0x108   : > { %p1506_p8 = scmp.le.f32.partialorder %s1589_s14, %s1505_s16 }
 0x109   : > { %s1833_s17 = smov (!%p1506_p8), 0  }
 0x10a   : > { %1509 = sbr.rel (%p1506_p8) target bundleno = 948 (0x3b4), region = 467 }
 0x10f LB: >> { %s1838_s20 = smov 0   ;;  %s1681_s17 = sphi %s1833_s17, %s2079_s17  }
 0x110 LB: >>> { %s478_s30 = smov [#allocation20]  ;;  %v482_v6 = vmov %v1797_v6  ;;  %v485_v7 = vmov %v1799_v7  ;;  %s498_s21 = smov [#allocation21]  ;;  %vm801_vm14 = vcmp.eq.s32.totalorder %v1799_v7, 0  ;;  %vm813_vm15 = vcmp.eq.s32.totalorder %v1799_v7, 3  ;;  %s1685_s20 = sphi %s1838_s20, %s477_s20  }
 0x111   : >>> { %v502_v6 = vmov %v1797_v6  ;;  %v505_v7 = vmov %v1799_v7  ;;  %v486_v54 = vld [vmem:[%s478_s30] sm:$0xf]  ;;  %vm489_vm5 = vcmp.eq.s32.totalorder %v485_v7, %v482_v6  ;;  %s518_s22 = smov [#allocation23]  ;;  %s479_s29 = smov [#allocation24] }
 0x112   : >>> { %vm509_vm6 = vcmp.eq.s32.totalorder %v505_v7, %v502_v6  ;;  %v522_v6 = vmov %v1797_v6  ;;  %v525_v7 = vmov %v1799_v7  ;;  %v490_v55 = vsel %vm489_vm5, %v486_v54, 0.0  ;;  %v506_v56 = vld [vmem:[%s498_s21] sm:$0xf]  ;;  %s499_s14 = smov [#allocation25]  ;;  %s519_s15 = smov [#allocation26] }
 0x113   : >>> { %vm529_vm7 = vcmp.eq.s32.totalorder %v525_v7, %v522_v6  ;;  %v491_v57 = vrot.slane %v490_v55, 4  ;;  %v510_v58 = vsel %vm509_vm6, %v506_v56, 0.0  ;;  %v526_v59 = vld [vmem:[%s518_s22] sm:$0xf]  ;;  %s542_s16 = smov [#allocation25]  ;;  %s540_s30 = smov [#allocation24]  ;;  %v591_v6 = vmov %v1797_v6 }
 0x114   : >>> { %v511_v60 = vrot.slane %v510_v58, 4  ;;  %v530_v61 = vsel %vm529_vm7, %v526_v59, 0.0  ;;  %s544_s21 = smov [#allocation26]  ;;  %s579_s22 = smov [#allocation27]  ;;  %v594_v7 = vmov %v1799_v7  ;;  %v606_v6 = vmov %v1797_v6 }
 0x115   : >>> { %v492_v62 = vadd.f32 %v491_v57, %v490_v55  ;;  %v531_v63 = vrot.slane %v530_v61, 4  ;;  %v609_v7 = vmov %v1799_v7  ;;  %vm596_vm12 = vcmp.eq.s32.totalorder %v594_v7, %v591_v6  ;;  %s1857_s24 = smov [#allocation22]  ;;  %s1863_s23 = smov [#allocation14] }
 0x116   : >>> { %v512_v0 = vadd.f32 %v511_v60, %v510_v58  ;;  %vm611_vm13 = vcmp.eq.s32.totalorder %v609_v7, %v606_v6  ;;  %s841_s11 = smov [#allocation31]  ;;  %s1869_s27 = smov [#allocation18]  ;;  %v627_v55 = vld [vmem:[%s1857_s24] sm:$0xf]  ;;  %v704_v6 = vmov %v1797_v6  ;;  %v707_v7 = vmov %v1799_v7 }
 0x117   : >>> { %v493_v1 = vrot.slane %v492_v62, 2  ;;  %v532_v2 = vadd.f32 %v531_v63, %v530_v61  ;;  %v850_v58 = vld [vmem:[%s1863_s23] sm:$0xf]  ;;  %s619_s26 = smov [#allocation32]  ;;  %s843_s25 = smov [#allocation32]  ;;  %v718_v6 = vmov %v1797_v6  ;;  %v721_v7 = vmov %v1799_v7 }
 0x118   : >>> { %v513_v3 = vrot.slane %v512_v0, 2  ;;  %v852_v61 = vld [vmem:[%s1869_s27] sm:$0xf]  ;;  %vm711_vm0 = vcmp.eq.s32.totalorder %v707_v7, %v704_v6  ;;  %v677_v6 = vmov %v1797_v6  ;;  %v680_v7 = vmov %v1799_v7  ;;  %s477_s20 = sadd.s32 1, %s1685_s20  }
 0x119   : >>> { %v494_v4 = vadd.f32 %v493_v1, %v492_v62  ;;  %v533_v5 = vrot.slane %v532_v2, 2  ;;  %v691_v6 = vmov %v1797_v6  ;;  %v694_v7 = vmov %v1799_v7  ;;  %p474_p9 = scmp.ge.s32.totalorder %s477_s20, 7  }
 0x11a   : >>> { %v514_v8 = vadd.f32 %v513_v3, %v512_v0  ;;  %vm726_vm1 = vcmp.eq.s32.totalorder %v721_v7, %v718_v6  ;;  %vm685_vm3 = vcmp.eq.s32.totalorder %v680_v7, %v677_v6  ;;  %vm698_vm4 = vcmp.eq.s32.totalorder %v694_v7, %v691_v6 }
 0x11b   : >>> { %v495_v9 = vrot.slane %v494_v4, 1  ;;  %v534_v10 = vadd.f32 %v533_v5, %v532_v2  ;;  %vm740_vm5 = vcmp.eq.s32.totalorder %v1797_v6, 0  ;;  %vm744_vm6 = vcmp.eq.s32.totalorder %v1797_v6, 1 }
 0x11c   : >>> { %v515_v11 = vrot.slane %v514_v8, 1  ;;  %vm757_vm7 = vcmp.eq.s32.totalorder %v1797_v6, 3  ;;  %v378_v6 = vmov (%p474_p9), %v1797_v6  ;;  %v381_v7 = vmov (%p474_p9), %v1799_v7 }
 0x11d   : >>> { %v496_v12 = vadd.f32 %v495_v9, %v494_v4  ;;  %v535_v13 = vrot.slane %v534_v10, 1  ;;  %v431_v6 = vmov (%p474_p9), %v1797_v6 }
 0x11e   : >>> { %v516_v14 = vadd.f32 %v515_v11, %v514_v8 }
 0x11f   : >>> { %497 = vst [vmem:[%s479_s29] sm:$0x1] %v496_v12  ;;  %v536_v15 = vadd.f32 %v535_v13, %v534_v10  ;;  %s581_s29 = smov [#allocation28] }
 0x120   : >>> { %517 = vst [vmem:[%s499_s14] sm:$0x1] %v516_v14  ;;  %s538_s14 = smov [#allocation29] }
 0x121   : >>> { %537 = vst [vmem:[%s519_s15] sm:$0x1] %v536_v15  ;;  %s539_s15 = smov [#allocation30]  ;;  %s583_s14 = smov %s538_s14 }
 0x122   : >>> { %s585_s15 = smov %s539_s15 }
 0x126   : >>> { %v541_v18 = vld [vmem:[%s540_s30] sm:$0xff]  ;;  %s602_s30 = smov [#allocation30] }
 0x127   : >>> { %v543_v16 = vld [vmem:[%s542_s16] sm:$0xff]  ;;  %v564_v33 = vand.u32 2147483647, %v541_v18  ;;  %s587_s16 = smov [#allocation29] }
 0x128   : >>> { %v547_v17 = vmul.f32 2.0, %v543_v16  ;;  %v545_v19 = vld [vmem:[%s544_s21] sm:$0xff]  ;;  %v565_v36 = vand.u32 2147483647, %v543_v16  ;;  %s600_s21 = smov [#allocation31] }
 0x129   : >>> { %v546_v20 = vsub.f32 %v545_v19, %v541_v18  ;;  %v566_v34 = vand.u32 2147483647, %v545_v19 }
 0x12a   : >>> { %1639 = vrcp.f32 %v547_v17 }
 0x12b   : >>> { %v567_v35 = vmin.f32 %v564_v33, %v566_v34 }
 0x12d   : >>> { %v568_v37 = vmul.f32 1.1920929e-08, %v567_v35 }
 0x12f   : >>> { %vm569_vm11 = vcmp.le.f32.partialorder %v565_v36, %v568_v37 }
 0x137   : >>> { %v1640_v21 = vpop.eup %1639 }
 0x138   : >>> { %v549_v22 = vmul.f32 %v1640_v21, %v546_v20 }
 0x13a   : >>> { %v551_v23 = vmul.f32 %v549_v22, %v549_v22  ;;  %vm550_vm10 = vcmp.ge.f32.partialorder %v549_v22, 0.0 }
 0x13c   : >>> { %v552_v24 = vadd.f32 1.0, %v551_v23 }
 0x13e   : >>> { %1641 = vrsqrt.f32 %v552_v24  ;;  %vm555_vm8 = vcmp.eq.f32.partialorder %v552_v24, inf  ;;  %v558_v26 = vand.u32 2147483648, %v552_v24  ;;  %vm557_vm9 = vcmp.eq.f32.partialorder %v552_v24, 0.0 }
 0x14b   : >>> { %v1642_v25 = vpop.eup %1641 }
 0x14c   : >>> { %v554_v27 = vmul.f32 %v1642_v25, %v552_v24 }
 0x14e   : >>> { %v556_v28 = vsel %vm555_vm8, %v552_v24, %v554_v27  ;;  %vm393_vm8 = vcmp.eq.s32.totalorder (%p474_p9), %v381_v7, %v378_v6  ;;  %v434_v7 = vmov (%p474_p9), %v1799_v7  ;;  %v397_v6 = vmov (%p474_p9), %v1797_v6 }
 0x14f   : >>> { %v559_v29 = vsel %vm557_vm9, %v558_v26, %v556_v28  ;;  %v400_v7 = vmov (%p474_p9), %v1799_v7  ;;  %v414_v6 = vmov (%p474_p9), %v1797_v6  ;;  %vm446_vm9 = vcmp.eq.s32.totalorder (%p474_p9), %v434_v7, %v431_v6 }
 0x150   : >>> { %v560_v30 = vxor.u32 2147483648, %v559_v29  ;;  %v417_v7 = vmov (%p474_p9), %v1799_v7 }
 0x152   : >>> { %v561_v31 = vsel %vm550_vm10, %v559_v29, %v560_v30 }
 0x153   : >>> { %v562_v32 = vadd.f32 %v561_v31, %v549_v22 }
 0x155   : >>> { %1643 = vrcp.f32 %v562_v32 }
 0x162   : >>> { %v1644_v38 = vpop.eup %1643 }
 0x163   : >>> { %v570_v39 = vsel %vm569_vm11, 0.0, %v1644_v38 }
 0x164   : >>> { %v571_v40 = vmul.f32 %v570_v39, %v570_v39  ;;  %v575_v41 = vmul.f32 %v570_v39, %v543_v16 }
 0x166   : >>> { %v572_v42 = vadd.f32 1.0, %v571_v40  ;;  %v576_v43 = vsub.f32 %v541_v18, %v575_v41  ;;  %v578_v44 = vadd.f32 %v575_v41, %v545_v19 }
 0x168   : >>> { %1645 = vrsqrt.f32 %v572_v42  ;;  %580 = vst [vmem:[%s579_s22] sm:$0xff] %v576_v43  ;;  %582 = vst [vmem:[%s581_s29] sm:$0xff] %v578_v44  ;;  %s617_s22 = smov [#allocation31]  ;;  %s1853_s29 = smov [#allocation20] }
 0x169   : >>> { %v625_v53 = vld [vmem:[%s1853_s29] sm:$0xf] }
 0x175   : >>> { %v1646_v45 = vpop.eup %1645 }
 0x176   : >>> { %584 = vst [vmem:[%s583_s14] sm:$0xff] %v1646_v45  ;;  %v574_v46 = vmul.f32 %v1646_v45, %v570_v39  ;;  %s615_s14 = smov [#allocation32] }
 0x178   : >>> { %586 = vst [vmem:[%s585_s15] sm:$0xff] %v574_v46  ;;  %s1855_s15 = smov [#allocation21] }
 0x179   : >>> { %v626_v54 = vld [vmem:[%s1855_s15] sm:$0xf] }
 0x17d   : >>> { %v588_v47 = vld [vmem:[%s587_s16] ss:$0 sm:$0xff]  ;;  %s1859_s16 = smov [#allocation23] }
 0x17e   : >>> { %v597_v48 = vsel %vm596_vm12, %v588_v47, 0.0  ;;  %v628_v56 = vld [vmem:[%s1859_s16] sm:$0xf] }
 0x17f   : >>> { %598 = vadd.xlane.f32.xlu0 %v597_v48  ;;  %v603_v49 = vld [vmem:[%s602_s30] ss:$0 sm:$0xff]  ;;  %s1861_s30 = smov [#allocation12] }
 0x180   : >>> { %v612_v50 = vsel %vm611_vm13, %v603_v49, 0.0  ;;  %v849_v57 = vld [vmem:[%s1861_s30] sm:$0xf] }
 0x183   : >>> { %613 = vadd.xlane.f32.xlu0 %v612_v50 }
 0x208   : >>> { %v599_v51 = vpop.xlane.xlu0 %598 }
 0x209   : >>> { %601 = vst [vmem:[%s600_s21] sm:$0xff] %v599_v51  ;;  %s1865_s21 = smov [#allocation16] }
 0x20a   : >>> { %v851_v59 = vld [vmem:[%s1865_s21] sm:$0xf] }
 0x20c   : >>> { %v614_v52 = vpop.xlane.xlu0 %613 }
 0x20d   : >>> { %616 = vst [vmem:[%s615_s14] sm:$0xff] %v614_v52  ;;  %s1889_s14 = smov [#allocation23] }
 0x210   : >>> { %v618_v60 = vld [vmem:[%s617_s22] sm:$0xff]  ;;  %s1887_s22 = smov [#allocation22] }
 0x211   : >>> { %v842_v62 = vld [vmem:[%s841_s11] sm:$0xff]  ;;  %v629_v63 = vmul.f32 %v625_v53, %v618_v60  ;;  %v632_v0 = vmul.f32 %v626_v54, %v618_v60  ;;  %v636_v1 = vmul.f32 %v627_v55, %v618_v60  ;;  %v639_v2 = vmul.f32 %v628_v56, %v618_v60  ;;  %s1885_s11 = smov [#allocation12] }
 0x212   : >>> { %v853_v3 = vmul.f32 %v849_v57, %v842_v62  ;;  %v856_v4 = vmul.f32 %v850_v58, %v842_v62  ;;  %v860_v5 = vmul.f32 %v851_v59, %v842_v62  ;;  %v863_v8 = vmul.f32 %v852_v61, %v842_v62 }
 0x214   : >>> { %v620_v9 = vld [vmem:[%s619_s26] sm:$0xff]  ;;  %s647_s26 = smov [#allocation30] }
 0x215   : >>> { %v844_v10 = vld [vmem:[%s843_s25] sm:$0xff]  ;;  %v630_v11 = vmul.f32 %v627_v55, %v620_v9  ;;  %v633_v12 = vmul.f32 %v628_v56, %v620_v9  ;;  %v635_v13 = vmul.f32 %v625_v53, %v620_v9  ;;  %v638_v14 = vmul.f32 %v626_v54, %v620_v9  ;;  %s645_s25 = smov [#allocation29] }
 0x216   : >>> { %v854_v15 = vmul.f32 %v851_v59, %v844_v10  ;;  %v857_v16 = vmul.f32 %v852_v61, %v844_v10  ;;  %v859_v17 = vmul.f32 %v849_v57, %v844_v10  ;;  %v862_v18 = vmul.f32 %v850_v58, %v844_v10  ;;  %v646_v27 = vld [vmem:[%s645_s25] ss:$0 sm:$0xff]  ;;  %s674_s25 = smov [#allocation27] }
 0x217   : >>> { %v631_v19 = vsub.f32 %v629_v63, %v630_v11  ;;  %v634_v20 = vsub.f32 %v632_v0, %v633_v12  ;;  %v637_v21 = vadd.f32 %v636_v1, %v635_v13  ;;  %v640_v22 = vadd.f32 %v639_v2, %v638_v14  ;;  %v648_v28 = vld [vmem:[%s647_s26] ss:$0 sm:$0xff]  ;;  %s673_s26 = smov [#allocation20] }
 0x218   : >>> { %v855_v23 = vsub.f32 %v853_v3, %v854_v15  ;;  %v858_v24 = vsub.f32 %v856_v4, %v857_v16  ;;  %v861_v25 = vadd.f32 %v860_v5, %v859_v17  ;;  %v864_v26 = vadd.f32 %v863_v8, %v862_v18  ;;  %v681_v63 = vld [vmem:[%s674_s25] ss:$0 sm:$0xff]  ;;  %s917_s25 = sadd.s32 (%p474_p9), 1, %s1681_s17  }
 0x219   : >>> { %642 = vst [vmem:[%s1855_s15] sm:$0xf] %v634_v20  ;;  %644 = vst [vmem:[%s1859_s16] sm:$0xf] %v640_v22  ;;  %s1891_s15 = smov [#allocation20]  ;;  %s715_s16 = smov [#allocation28] }
 0x21a   : >>> { %641 = vst [vmem:[%s1853_s29] sm:$0xf] %v631_v19  ;;  %643 = vst [vmem:[%s1857_s24] sm:$0xf] %v637_v21  ;;  %s1893_s24 = smov [#allocation16]  ;;  %s1901_s29 = smov [#allocation21]  ;;  %v722_v59 = vld [vmem:[%s715_s16] ss:$0 sm:$0xff] }
 0x21b   : >>> { %865 = vst [vmem:[%s1861_s30] sm:$0xf] %v855_v23  ;;  %866 = vst [vmem:[%s1863_s23] sm:$0xf] %v858_v24  ;;  %s1895_s23 = smov [#allocation14]  ;;  %s701_s30 = smov [#allocation22] }
 0x21c   : >>> { %867 = vst [vmem:[%s1865_s21] sm:$0xf] %v861_v25  ;;  %868 = vst [vmem:[%s1869_s27] sm:$0xf] %v864_v26  ;;  %s1899_s27 = smov [#allocation18]  ;;  %s714_s21 = smov [#allocation23] }
 0x21d   : >>> { %s817_s16 = smov [#allocation21]  ;;  %p470_p10 = scmp.ge.s32.totalorder (%p474_p9), %s917_s25, 15 }
 0x21e   : >> { %s2079_s17 = smov (%p474_p9), %s917_s25 }
 0x220   : >>> { %v656_v30 = vld [vmem:[%s1889_s14] sm:$0xf] }
 0x221   : >>> { %v655_v29 = vld [vmem:[%s1887_s22] sm:$0xf]  ;;  %v664_v36 = vmul.f32 %v656_v30, %v648_v28  ;;  %v667_v42 = vmul.f32 %v656_v30, %v646_v27 }
 0x222   : >>> { %v653_v31 = vld [vmem:[%s1891_s15] sm:$0xf]  ;;  %v663_v35 = vmul.f32 %v655_v29, %v646_v27  ;;  %v666_v37 = vmul.f32 %v655_v29, %v648_v28 }
 0x223   : >>> { %v871_v32 = vld [vmem:[%s1885_s11] ss:$0 sm:$0xff]  ;;  %v1567_v34 = vld [vmem:[%s1885_s11 + $0x3] ss:$0 sm:$0xff]  ;;  %v657_v48 = vmul.f32 %v653_v31, %v646_v27  ;;  %v660_v49 = vmul.f32 %v653_v31, %v648_v28 }
 0x224   : >>> { %v1566_v33 = vld [vmem:[%s1885_s11 - $0x1] sm:$0xe]  ;;  %v1571_v45 = vld [vmem:[%s1895_s23 + $0x3] ss:$0 sm:$0xff]  ;;  %v665_v47 = vsub.f32 %v663_v35, %v664_v36  ;;  %v668_v53 = vadd.f32 %v667_v42, %v666_v37 }
 0x225   : >>> { %v878_v38 = vsel %vm801_vm14, %v871_v32, %v1566_v33  ;;  %v882_v39 = vld [vmem:[%s1893_s24] ss:$0 sm:$0xff]  ;;  %v1569_v40 = vld [vmem:[%s1893_s24 + $0x1] sm:$0x7] }
 0x226   : >>> { %v895_v41 = vld [vmem:[%s1895_s23] ss:$0 sm:$0xff]  ;;  %881 = vst [vmem:[%s1885_s11] sm:$0xf] %v878_v38  ;;  %v890_v43 = vsel %vm813_vm15, %v1567_v34, %v1569_v40  ;;  %v1573_v51 = vld [vmem:[%s1899_s27 + $0x1] sm:$0x7]  ;;  %671 = vst [vmem:[%s1887_s22] sm:$0xf] %v665_v47 }
 0x227   : >>> { %v1570_v44 = vld [vmem:[%s1895_s23 - $0x1] sm:$0xe]  ;;  %1568 = vst [vmem:[%s1885_s11 + $0x1] sm:$0x1] %v882_v39  ;;  %892 = vst [vmem:[%s1893_s24] sm:$0xf] %v890_v43  ;;  %v914_v54 = vsel %vm813_vm15, %v1571_v45, %v1573_v51  ;;  %s688_s11 = smov [#allocation21] }
 0x228   : >>> { %v906_v46 = vld [vmem:[%s1899_s27] ss:$0 sm:$0xff]  ;;  %v902_v50 = vsel %vm801_vm14, %v895_v41, %v1570_v44  ;;  %672 = vst [vmem:[%s1889_s14] sm:$0xf] %v668_v53  ;;  %s1943_s22 = smov [#allocation22]  ;;  %s1688_s14 = smov 1  }
 0x229   : >>> { %v654_v52 = vld [vmem:[%s1901_s29] sm:$0xf]  ;;  %905 = vst [vmem:[%s1895_s23] sm:$0xf] %v902_v50  ;;  %916 = vst [vmem:[%s1899_s27] sm:$0xf] %v914_v54  ;;  %s730_s24 = smov [#allocation21]  ;;  %s1946_s27 = smov [#allocation23] }
 0x22a   : >>> { %v658_v55 = vmul.f32 %v654_v52, %v648_v28  ;;  %v661_v56 = vmul.f32 %v654_v52, %v646_v27  ;;  %1572 = vst [vmem:[%s1895_s23 + $0x1] sm:$0x1] %v906_v46  ;;  %s1689_s23 = smov 127  }
 0x22c   : >>> { %v659_v57 = vsub.f32 %v657_v48, %v658_v55  ;;  %v662_v58 = vadd.f32 %v661_v56, %v660_v49 }
 0x22d   : >>> { %v708_v60 = vld [vmem:[%s701_s30] sm:$0xf] }
 0x22e   : >>> { %669 = vst [vmem:[%s1891_s15] sm:$0xf] %v659_v57  ;;  %670 = vst [vmem:[%s1901_s29] sm:$0xf] %v662_v58  ;;  %v712_v61 = vsel %vm711_vm0, 0.0, %v708_v60  ;;  %s729_s15 = smov [#allocation20]  ;;  %s793_s29 = smov [#allocation20] }
 0x22f   : >>> { %v723_v62 = vld [vmem:[%s714_s21] sm:$0xf]  ;;  %713 = vst [vmem:[%s701_s30] sm:$0xf] %v712_v61  ;;  %s794_s30 = smov [#allocation22] }
 0x230   : >>> { %v727_v0 = vsel %vm726_vm1, %v722_v59, %v723_v62 }
 0x231   : >>> { %728 = vst [vmem:[%s714_s21] sm:$0xf] %v727_v0  ;;  %s818_s21 = smov [#allocation23] }
 0x235   : >>> { %v682_v1 = vld [vmem:[%s673_s26] sm:$0xf] }
 0x236   : >>> { %v695_v2 = vld [vmem:[%s688_s11] sm:$0xf]  ;;  %v686_v3 = vsel %vm685_vm3, %v681_v63, %v682_v1 }
 0x237   : >>> { %v699_v4 = vsel %vm698_vm4, 0.0, %v695_v2  ;;  %687 = vst [vmem:[%s673_s26] sm:$0xf] %v686_v3  ;;  %v767_v5 = vld [vmem:[%s1943_s22] sm:$0xf]  ;;  %s382_s26 = smov (%p474_p9), [#allocation20] }
 0x238   : >>> { %700 = vst [vmem:[%s688_s11] sm:$0xf] %v699_v4  ;;  %768 = vrot.lane.b32.xlu0 %v767_v5, %s1688_s14  ;;  %v763_v11 = vld [vmem:[%s1946_s27] sm:$0xf]  ;;  %s401_s11 = smov (%p474_p9), [#allocation21] }
 0x239   : >>> { %v784_v12 = vld [vmem:[%s1946_s27] sm:$0xf] }
 0x23a   : >>> { %v766_v30 = vld [vmem:[%s1943_s22] sm:$0xf] }
 0x23e   : >>> { %v735_v8 = vld [vmem:[%s729_s15] sm:$0xf] }
 0x23f   : >>> { %736 = vrot.lane.b32.xlu1 %v735_v8, %s1688_s14  ;;  %v731_v9 = vld [vmem:[%s730_s24] sm:$0xf] }
 0x240   : >>> { %v752_v10 = vld [vmem:[%s730_s24] sm:$0xf] }
 0x241   : >>> { %v734_v18 = vld [vmem:[%s729_s15] sm:$0xf] }
 0x243   : >>> { %732 = vrot.lane.b32.xlu1 %v731_v9, %s1688_s14 }
 0x247   : >>> { %753 = vrot.lane.b32.xlu1 %v752_v10, %s1689_s23 }
 0x24b   : >>> { %764 = vrot.lane.b32.xlu1 %v763_v11, %s1688_s14  ;;  %s435_s14 = smov (%p474_p9), [#allocation23] }
 0x24f   : >>> { %785 = vrot.lane.b32.xlu1 %v784_v12, %s1689_s23 }
 0x2aa   : >>> { %v769_v20 = vpop.permute.xlu0 %768 }
 0x2ab   : >>> { %v773_v22 = vsel %vm740_vm5, %v767_v5, %v769_v20 }
 0x2b1   : >>> { %v737_v13 = vpop.permute.xlu1 %736 }
 0x2b2   : >>> { %v741_v14 = vsel %vm740_vm5, %v735_v8, %v737_v13 }
 0x2b5   : >>> { %v733_v15 = vpop.permute.xlu1 %732 }
 0x2b6   : >>> { %v745_v16 = vsel %vm744_vm6, %v733_v15, %v741_v14 }
 0x2b7   : >>> { %v751_v17 = vsel %vm1427_vm2, %v745_v16, 0.0 }
 0x2b8   : >>> { %759 = vst [vmem:[%s729_s15] sm:$0xf] %v751_v17 }
 0x2b9   : >>> { %v754_v19 = vpop.permute.xlu1 %753 }
 0x2ba   : >>> { %v758_v21 = vsel %vm757_vm7, %v734_v18, %v754_v19 }
 0x2bb   : >>> { %760 = vst [vmem:[%s730_s24] sm:$0xf] %v758_v21 }
 0x2bd   : >>> { %v765_v23 = vpop.permute.xlu1 %764 }
 0x2be   : >>> { %v777_v24 = vsel %vm744_vm6, %v765_v23, %v773_v22 }
 0x2bf   : >>> { %v795_v25 = vld [vmem:[%s793_s29] ss:$0 sm:$0xff]  ;;  %v1559_v27 = vld [vmem:[%s793_s29 + $0x3] ss:$0 sm:$0xff]  ;;  %v783_v29 = vsel %vm1427_vm2, %v777_v24, 0.0 }
 0x2c0   : >>> { %v1558_v26 = vld [vmem:[%s793_s29 - $0x1] sm:$0xe]  ;;  %791 = vst [vmem:[%s1943_s22] sm:$0xf] %v783_v29  ;;  %s418_s22 = smov (%p474_p9), [#allocation22] }
 0x2c1   : >>> { %v802_v28 = vsel %vm801_vm14, %v795_v25, %v1558_v26  ;;  %v786_v31 = vpop.permute.xlu1 %785 }
 0x2c2   : >>> { %805 = vst [vmem:[%s793_s29] sm:$0xf] %v802_v28  ;;  %v819_v32 = vld [vmem:[%s817_s16] ss:$0 sm:$0xff]  ;;  %v1563_v34 = vld [vmem:[%s817_s16 + $0x3] ss:$0 sm:$0xff]  ;;  %v790_v35 = vsel %vm757_vm7, %v766_v30, %v786_v31 }
 0x2c3   : >>> { %v1562_v33 = vld [vmem:[%s817_s16 - $0x1] sm:$0xe]  ;;  %792 = vst [vmem:[%s1946_s27] sm:$0xf] %v790_v35 }
 0x2c4   : >>> { %v826_v36 = vsel %vm801_vm14, %v819_v32, %v1562_v33 }
 0x2c5   : >>> { %829 = vst [vmem:[%s817_s16] sm:$0xf] %v826_v36 }
 0x2c7   : >>> { %v806_v37 = vld [vmem:[%s794_s30] ss:$0 sm:$0xff]  ;;  %v1561_v38 = vld [vmem:[%s794_s30 + $0x1] sm:$0x7] }
 0x2c8   : >>> { %1560 = vst [vmem:[%s793_s29 + $0x1] sm:$0x1] %v806_v37  ;;  %v814_v39 = vsel %vm813_vm15, %v1559_v27, %v1561_v38 }
 0x2c9   : >>> { %816 = vst [vmem:[%s794_s30] sm:$0xf] %v814_v39 }
 0x2ca   : >>> { %v830_v40 = vld [vmem:[%s818_s21] ss:$0 sm:$0xff]  ;;  %v1565_v41 = vld [vmem:[%s818_s21 + $0x1] sm:$0x7] }
 0x2cb   : >>> { %1564 = vst [vmem:[%s817_s16 + $0x1] sm:$0x1] %v830_v40  ;;  %v838_v42 = vsel %vm813_vm15, %v1563_v34, %v1565_v41 }
 0x2cc   : >>> { %840 = vst [vmem:[%s818_s21] sm:$0xf] %v838_v42  ;;  %476 = sbr.rel (!%p474_p9) target bundleno = 272 (0x110), region = 462 }
 0x2cf   : >> { %v388_v43 = vld [vmem:[%s382_s26] sm:$0xf] (%p474_p9) }
 0x2d0   : >> { %v389_v45 = vsel (%p474_p9), %vm1427_vm2, %v388_v43, 0.0  ;;  %v424_v47 = vld [vmem:[%s418_s22] sm:$0xf] (%p474_p9) }
 0x2d1   : >> { %v390_v49 = vmul.f32 %v389_v45, %v389_v45  ;;  %v425_v51 = vsel %vm1427_vm2, %v424_v47, 0.0 }
 0x2d2   : >> { %v407_v44 = vld [vmem:[%s401_s11] sm:$0xf]  ;;  %v426_v53 = vmul.f32 %v425_v51, %v425_v51 }
 0x2d3   : >> { %v408_v46 = vsel %vm1427_vm2, %v407_v44, 0.0  ;;  %v441_v48 = vld [vmem:[%s435_s14] sm:$0xf]  ;;  %v394_v56 = vsel %vm393_vm8, 0.0, %v390_v49 }
 0x2d4   : >> { %v409_v50 = vmul.f32 %v408_v46, %v408_v46  ;;  %v442_v52 = vsel %vm1427_vm2, %v441_v48, 0.0 }
 0x2d5   : >> { %v443_v55 = vmul.f32 %v442_v52, %v442_v52 }
 0x2d6   : >> { %v411_v54 = vadd.f32 %v409_v50, %v390_v49  ;;  %v410_v57 = vadd.f32 %v409_v50, %v394_v56 }
 0x2d7   : >> { %v447_v60 = vsel %vm446_vm9, 0.0, %v443_v55 }
 0x2d8   : >> { %v428_v58 = vadd.f32 %v426_v53, %v411_v54  ;;  %v427_v59 = vadd.f32 %v426_v53, %v410_v57 }
 0x2da   : >> { %v449_v61 = vadd.f32 %v443_v55, %v428_v58  ;;  %v448_v62 = vadd.f32 %v447_v60, %v427_v59 }
 0x2dc   : >> { %450 = vadd.xlane.f32.xlu0 %v449_v61 }
 0x2e0   : >> { %458 = vadd.xlane.f32.xlu0 %v448_v62 }
 0x365   : >> { %v451_v63 = vpop.xlane.xlu0 %450 }
 0x366   : >> { %v452_v0 = vrot.slane %v451_v63, 4 }
 0x368   : >> { %v453_v1 = vadd.f32 %v452_v0, %v451_v63 }
 0x369   : >> { %v459_v2 = vpop.xlane.xlu0 %458 }
 0x36a   : >> { %v454_v3 = vrot.slane %v453_v1, 2  ;;  %v460_v4 = vrot.slane %v459_v2, 4 }
 0x36c   : >> { %v461_v5 = vadd.f32 %v460_v4, %v459_v2  ;;  %v455_v8 = vadd.f32 %v454_v3, %v453_v1 }
 0x36e   : >> { %v462_v9 = vrot.slane %v461_v5, 2  ;;  %v456_v11 = vrot.slane %v455_v8, 1 }
 0x370   : >> { %v463_v10 = vadd.f32 %v462_v9, %v461_v5  ;;  %v457_v14 = vadd.f32 %v456_v11, %v455_v8 }
 0x372   : >> { %v464_v12 = vrot.slane %v463_v10, 1 }
 0x374   : >> { %v465_v13 = vadd.f32 %v464_v12, %v463_v10 }
 0x376   : >> { %1592 = vpush %v465_v13 }
 0x377   : >> { %1594 = vpush %v457_v14 }
 0x3a7   : >> { %s1593_s20 = spop %1592 }
 0x3a8   : >> { %s1595_s15 = spop %1594 }
 0x3a9   : >> { %s468_s24 = smul.f32 1e-10, %s1595_s15 }
 0x3ab   : >> { %p469_p11 = scmp.le.f32.partialorder %s1593_s20, %s468_s24 }
 0x3ad   : >> { %p471_p12 = por %p470_p10, %p469_p11 }
 0x3af   : > { %919 = sbr.rel (!%p471_p12) target bundleno = 271 (0x10f), region = 473 }
 0x3b4 PF: > { %s924_s23 = smov [#allocation20]  ;;  %v928_v6 = vmov %v1797_v6  ;;  %v931_v7 = vmov %v1799_v7  ;;  %v984_v15 = vld [vmem:[#allocation12] sm:$0xf]  ;;  %v992_v16 = vld [vmem:[#allocation14] sm:$0xf]  ;;  %s2080_s17 = scalar_lea.vmem [#allocation13], %s1793_s28 }
 0x3b5   : > { %v948_v6 = vmov %v1797_v6  ;;  %v951_v7 = vmov %v1799_v7  ;;  %v932_v17 = vld [vmem:[%s924_s23] sm:$0xf]  ;;  %vm935_vm10 = vcmp.eq.s32.totalorder %v931_v7, %v928_v6  ;;  %987 = vst [vmem:[%s2080_s17] sm:$0xf] %v984_v15  ;;  %s2081_s27 = scalar_lea.vmem [#allocation15], %s1793_s28  ;;  %v1000_v18 = vld [vmem:[#allocation16] sm:$0xf] }
 0x3b6   : > { %vm955_vm11 = vcmp.eq.s32.totalorder %v951_v7, %v948_v6  ;;  %995 = vst [vmem:[%s2081_s27] sm:$0xf] %v992_v16  ;;  %v936_v19 = vsel %vm935_vm10, %v932_v17, 0.0  ;;  %s944_s29 = smov [#allocation23]  ;;  %s2082_s16 = scalar_lea.vmem [#allocation17], %s1793_s28  ;;  %v1008_v20 = vld [vmem:[#allocation18] sm:$0xf] }
 0x3b7   : > { %1003 = vst [vmem:[%s2082_s16] sm:$0xf] %v1000_v18  ;;  %v937_v21 = vrot.slane %v936_v19, 4  ;;  %v952_v22 = vld [vmem:[%s944_s29] sm:$0xf]  ;;  %s2083_s30 = scalar_lea.vmem [#allocation19], %s1793_s28  ;;  %s920_s21 = sand.u32 7, %s1756_s12  }
 0x3b8   : > { %1011 = vst [vmem:[%s2083_s30] sm:$0xf] %v1008_v20  ;;  %v956_v23 = vsel %vm955_vm11, %v952_v22, 0.0  ;;  %s921_s25 = scalar_lea.vmem [#allocation8], %s920_s21  ;;  %s923_s26 = scalar_lea.vmem [#allocation10], %s920_s21 }
 0x3b9   : > { %v938_v24 = vadd.f32 %v937_v21, %v936_v19  ;;  %v957_v25 = vrot.slane %v956_v23, 4  ;;  %s925_s25 = smov %s921_s25  ;;  %s945_s26 = smov %s923_s26 }
 0x3ba   : > { %s2084_s11 = scalar_lea.vmem [#allocation9], %s1795_s18  ;;  %s2085_s22 = scalar_lea.vmem [#allocation11], %s1795_s18 }
 0x3bb   : > { %v939_v26 = vrot.slane %v938_v24, 2  ;;  %v958_v6 = vadd.f32 %v957_v25, %v956_v23  ;;  %s1039_s14 = sshrl.u32 (%p1770_p3), %s1756_s12, 3  ;;  %s2086_s20 = scalar_lea.vmem (%p1770_p3), [#allocation9], %s1795_s18 }
 0x3bc   : > { %s1580_s15 = sshll.u32 (%p1770_p3), %s1039_s14, 1 }
 0x3bd   : > { %v940_v7 = vadd.f32 %v939_v26, %v938_v24  ;;  %v959_v27 = vrot.slane %v958_v6, 2  ;;  %s1041_s17 = scalar_lea.vmem (%p1770_p3), %s2071_s4, %s1580_s15 }
 0x3bf   : > { %v941_v28 = vrot.slane %v940_v7, 1  ;;  %v960_v29 = vadd.f32 %v959_v27, %v958_v6 }
 0x3c1   : > { %v942_v30 = vadd.f32 %v941_v28, %v940_v7  ;;  %v961_v31 = vrot.slane %v960_v29, 1 }
 0x3c3   : > { %943 = vst [vmem:[%s925_s25] sm:$0x1] %v942_v30  ;;  %v962_v32 = vadd.f32 %v961_v31, %v960_v29 }
 0x3c5   : > { %963 = vst [vmem:[%s945_s26] sm:$0x1] %v962_v32 }
 0x3c9   : > { %1038 = sbr.rel (!%p1770_p3) target bundleno = 980 (0x3d4), region = 158 }
 0x3ca   : > { %v968_v33 = vld [vmem:[#allocation8] sm:$0x3] }
 0x3cb   : > { %971 = vst [vmem:[%s2084_s11] sm:$0x3] %v968_v33 }
 0x3cc   : > { %v976_v34 = vld [vmem:[#allocation10] sm:$0x3] }
 0x3cd   : > { %979 = vst [vmem:[%s2085_s22] sm:$0x3] %v976_v34 }
 0x3d2   : > { %v1058_v35 = vld [vmem:[%s2086_s20] sm:$0x3] }
 0x3d3   : > { %1059 = vst [vmem:[%s1041_s17] sm:$0x3] %v1058_v35 }
 0x3d4 PF: > { %1077 = sbr.rel (!%p1770_p3) target bundleno = 988 (0x3dc), region = 192  ;;  %s1078_s27 = sshrl.u32 (%p1770_p3), %s1756_s12, 3 }
 0x3d5   : > { %s2087_s29 = scalar_lea.vmem (%p1770_p3), [#allocation11], %s1795_s18  ;;  %s1581_s16 = sshll.u32 (%p1770_p3), %s1078_s27, 1 }
 0x3d6   : > { %s1080_s25 = scalar_lea.vmem (%p1770_p3), %s2072_s5, %s1581_s16 }
 0x3da   : > { %v1097_v36 = vld [vmem:[%s2087_s29] sm:$0x3] }
 0x3db   : > { %1098 = vst [vmem:[%s1080_s25] sm:$0x3] %v1097_v36 }
 0x3dc PF: > { %s1582_s26 = sshll.u32 %s1756_s12, 2  ;;  %s2088_s19 = scalar_lea.vmem [#allocation13], %s1793_s28 }
 0x3dd   : > { %v1132_v37 = vld [vmem:[%s2088_s19] sm:$0xf]  ;;  %s2089_s11 = scalar_lea.vmem [#allocation15], %s1793_s28  ;;  %s1115_s14 = scalar_lea.vmem %s2073_s6, %s1582_s26 }
 0x3de   : > { %v1167_v38 = vld [vmem:[%s2089_s11] sm:$0xf]  ;;  %s1150_s24 = scalar_lea.vmem %s2074_s7, %s1582_s26  ;;  %s2090_s23 = scalar_lea.vmem [#allocation17], %s1793_s28  ;;  %1133 = vst [vmem:[%s1115_s14] sm:$0xf] %v1132_v37 }
 0x3df   : > { %v1202_v39 = vld [vmem:[%s2090_s23] sm:$0xf]  ;;  %s2091_s17 = scalar_lea.vmem [#allocation19], %s1793_s28  ;;  %1168 = vst [vmem:[%s1150_s24] sm:$0xf] %v1167_v38  ;;  %s1185_s29 = scalar_lea.vmem %s2075_s8, %s1582_s26 }
 0x3e0   : > { %v1237_v40 = vld [vmem:[%s2091_s17] sm:$0xf]  ;;  %s1220_s21 = scalar_lea.vmem %s2076_s9, %s1582_s26  ;;  %1203 = vst [vmem:[%s1185_s29] sm:$0xf] %v1202_v39 }
 0x3e1   : > { %1238 = vst [vmem:[%s1220_s21] sm:$0xf] %v1237_v40 }
 0x3e2 PF: > { %s2092_s25 = sld [smem:[#allocation33_spill]]  ;;  %p13_p13 = scmp.ge.s32.totalorder %s1759_s13, 4  }
 0x3e3   : > { %s2093_s30 = smov %s1673_s10  ;;  %s2095_s11 = smov %s1759_s13 }
 0x3e4   :  { %15 = sbr.rel (!%p13_p13) target bundleno = 2 (0x2), region = 484 }
 0x3e8   : > { %s2094_s10 = smov %s2092_s25 }

// kernel: xpainn_forward.1
= control target key start
LH: loop header
LB: loop body
LE: loop exit
PB: predicated region body
PF: predicated region fallthrough
CT: control target
= control target key end

     0   :  { %v215_v0 = vlaneseq  ;;  %v1845_v4 = vmov 0.0   ;;  %v1846_v5 = vmov 1983009808   ;;  %vm259_vm0 = vcmask 261120   ;;  %s3316_s1 = inlined_call_operand.vmem [shape: f32[288,576], index: 1, kind: input, shape index: {}]   ;;  %s3317_s0 = inlined_call_operand.vmem [shape: f32[2,288], index: 0, kind: input, shape index: {}]   ;;  %s3318_s3 = inlined_call_operand.vmem [shape: f32[288,576], index: 3, kind: input, shape index: {}]   ;;  %s3319_s5 = inlined_call_operand.vmem [shape: f32[576,128], index: 5, kind: input, shape index: {}]   ;;  %s3320_s2 = inlined_call_operand.vmem [shape: f32[1,576], index: 2, kind: input, shape index: {}]   ;;  %s3321_s4 = inlined_call_operand.vmem [shape: f32[1,576], index: 4, kind: input, shape index: {}]   ;;  %s3322_s7 = inlined_call_operand.vmem [shape: f32[2,128], index: 7, kind: input, shape index: {}]   ;;  %s3323_s6 = inlined_call_operand.vmem [shape: f32[1,128], index: 6, kind: input, shape index: {}]   ;;  %s3324_s8 = inlined_call_operand.vmem [shape: f32[1,128], index: 8, kind: input, shape index: {}]   ;;  %s3325_s9 = inlined_call_operand.vmem [shape: f32[2,128], index: 9, kind: output, shape index: {}]  }
   0x1   :  { %v109_v1 = vld [vmem:[%s3316_s1 + $0x260] sm:$0xff]  ;;  %v108_v3 = vld [vmem:[%s3316_s1 + $0x258] sm:$0xff]  ;;  %397 = vmatprep.mubr.f32.mxu1 %v1845_v4  ;;  %v243_v6 = vunpack.c.l.s4 %v1846_v5  ;;  %v103_v11 = vld [vmem:[%s3316_s1 + $0x230] sm:$0xff]  ;;  %vm1847_vm1 = vmmov 0   ;;  %vm1401_vm2 = vcmask 523264  }
   0x2   :  { %v209_v2 = vld [vmem:[%s3316_s1 + $0x580] sm:$0xff]  ;;  %262 = vmatprep.subr.mxu0 %v109_v1  ;;  %v208_v7 = vld [vmem:[%s3316_s1 + $0x578] sm:$0xff]  ;;  %v1917_v10 = vshrl.u32 %v215_v0, 7  ;;  %v203_v12 = vld [vmem:[%s3316_s1 + $0x550] sm:$0xff] }
   0x3   :  { %357 = vmatprep.subr.mxu1 %v209_v2  ;;  %v104_v8 = vld [vmem:[%s3316_s1 + $0x238] sm:$0xff]  ;;  %263 = vmatpush1.msra.mxu0 %v108_v3  ;;  %v99_v13 = vld [vmem:[%s3316_s1 + $0x210] sm:$0xff]  ;;  %v244_v14 = vunpack.c.0.s8 %v243_v6  ;;  %v98_v16 = vld [vmem:[%s3316_s1 + $0x208] sm:$0xff] }
   0x4   :  { %v204_v9 = vld [vmem:[%s3316_s1 + $0x558] sm:$0xff]  ;;  %358 = vmatpush1.msra.mxu1 %v208_v7  ;;  %264 = vmatprep.subr.mxu0 %v104_v8  ;;  %v199_v15 = vld [vmem:[%s3316_s1 + $0x530] sm:$0xff]  ;;  %v198_v17 = vld [vmem:[%s3316_s1 + $0x528] sm:$0xff] }
   0x5   :  { %359 = vmatprep.subr.mxu1 %v204_v9  ;;  %265 = vmatpush1.msra.mxu0 %v103_v11  ;;  %v94_v18 = vld [vmem:[%s3316_s1 + $0x1e8] sm:$0xff]  ;;  %v1944_v20 = vsub.s32 %v244_v14, %v1917_v10  ;;  %v93_v21 = vld [vmem:[%s3316_s1 + $0x1e0] sm:$0xff]  ;;  %v111_v26 = vld [vmem:[%s3316_s1 + $0x270] sm:$0xff] }
   0x6   :  { %360 = vmatpush1.msra.mxu1 %v203_v12  ;;  %v194_v19 = vld [vmem:[%s3316_s1 + $0x508] sm:$0xff]  ;;  %266 = vmatprep.subr.mxu0 %v99_v13  ;;  %v193_v22 = vld [vmem:[%s3316_s1 + $0x500] sm:$0xff]  ;;  %v88_v27 = vld [vmem:[%s3316_s1 + $0x1b8] sm:$0xff] }
   0x7   :  { %361 = vmatprep.subr.mxu1 %v199_v15  ;;  %v1955_v23 = vld [vmem:[%s3317_s0] sm:$0x3f]  ;;  %267 = vmatpush1.msra.mxu0 %v98_v16  ;;  %v110_v29 = vld [vmem:[%s3316_s1 + $0x268] sm:$0xff]  ;;  %v84_v30 = vld [vmem:[%s3316_s1 + $0x198] sm:$0xff] }
   0x8   :  { %362 = vmatpush1.msra.mxu1 %v198_v17  ;;  %v89_v24 = vld [vmem:[%s3316_s1 + $0x1c0] sm:$0xff]  ;;  %v241_v25 = vcombine.high %v1955_v23, %v1955_v23  ;;  %268 = vmatprep.subr.mxu0 %v94_v18  ;;  %v106_v31 = vld [vmem:[%s3316_s1 + $0x248] sm:$0xff]  ;;  %v83_v32 = vld [vmem:[%s3316_s1 + $0x190] sm:$0xff] }
   0x9   :  { %363 = vmatprep.subr.mxu1 %v194_v19  ;;  %269 = vmatpush1.msra.mxu0 %v93_v21  ;;  %v105_v33 = vld [vmem:[%s3316_s1 + $0x240] sm:$0xff]  ;;  %v79_v34 = vld [vmem:[%s3316_s1 + $0x170] sm:$0xff]  ;;  %v78_v36 = vld [vmem:[%s3316_s1 + $0x168] sm:$0xff] }
   0xa   :  { %364 = vmatpush1.msra.mxu1 %v193_v22  ;;  %v1969_v28 = vrot.slane %v241_v25, %v1944_v20  ;;  %270 = vmatprep.subr.mxu0 %v89_v24  ;;  %v101_v35 = vld [vmem:[%s3316_s1 + $0x220] sm:$0xff]  ;;  %v100_v37 = vld [vmem:[%s3316_s1 + $0x218] sm:$0xff]  ;;  %v74_v38 = vld [vmem:[%s3316_s1 + $0x148] sm:$0xff] }
   0xb   :  { %404 = vmatprep.subr.mxu1 %v111_v26  ;;  %271 = vmatpush1.msra.mxu0 %v88_v27  ;;  %v96_v39 = vld [vmem:[%s3316_s1 + $0x1f8] sm:$0xff]  ;;  %v73_v40 = vld [vmem:[%s3316_s1 + $0x140] sm:$0xff]  ;;  %v95_v41 = vld [vmem:[%s3316_s1 + $0x1f0] sm:$0xff] }
   0xc   :  { %1632 = vmatmul.mubr.msk.f32.vlgmr.msra.gmra.mxu1 %vm259_vm0, %v1969_v28  ;;  %272 = vmatprep.subr.mxu0 %v84_v30  ;;  %v69_v42 = vld [vmem:[%s3316_s1 + $0x120] sm:$0xff]  ;;  %v91_v43 = vld [vmem:[%s3316_s1 + $0x1d0] sm:$0xff]  ;;  %v68_v44 = vld [vmem:[%s3316_s1 + $0x118] sm:$0xff] }
   0xd   :  { %405 = vmatpush1.msra.mxu1 %v110_v29  ;;  %273 = vmatpush1.msra.mxu0 %v83_v32  ;;  %v90_v45 = vld [vmem:[%s3316_s1 + $0x1c8] sm:$0xff]  ;;  %v64_v46 = vld [vmem:[%s3316_s1 + $0xf8] sm:$0xff]  ;;  %v63_v48 = vld [vmem:[%s3316_s1 + $0xf0] sm:$0xff] }
   0xe   :  { %406 = vmatprep.subr.mxu1 %v106_v31  ;;  %274 = vmatprep.subr.mxu0 %v79_v34  ;;  %v86_v47 = vld [vmem:[%s3316_s1 + $0x1a8] sm:$0xff]  ;;  %v85_v49 = vld [vmem:[%s3316_s1 + $0x1a0] sm:$0xff]  ;;  %v59_v50 = vld [vmem:[%s3316_s1 + $0xd0] sm:$0xff] }
   0xf   :  { %407 = vmatpush1.msra.mxu1 %v105_v33  ;;  %275 = vmatpush1.msra.mxu0 %v78_v36  ;;  %v81_v51 = vld [vmem:[%s3316_s1 + $0x180] sm:$0xff]  ;;  %v58_v52 = vld [vmem:[%s3316_s1 + $0xc8] sm:$0xff]  ;;  %v80_v53 = vld [vmem:[%s3316_s1 + $0x178] sm:$0xff] }
  0x10   :  { %408 = vmatprep.subr.mxu1 %v101_v35  ;;  %276 = vmatprep.subr.mxu0 %v74_v38  ;;  %v54_v54 = vld [vmem:[%s3316_s1 + $0xa8] sm:$0xff]  ;;  %v76_v55 = vld [vmem:[%s3316_s1 + $0x158] sm:$0xff]  ;;  %v53_v56 = vld [vmem:[%s3316_s1 + $0xa0] sm:$0xff] }
  0x11   :  { %409 = vmatpush1.msra.mxu1 %v100_v37  ;;  %277 = vmatpush1.msra.mxu0 %v73_v40  ;;  %v75_v57 = vld [vmem:[%s3316_s1 + $0x150] sm:$0xff]  ;;  %v49_v58 = vld [vmem:[%s3316_s1 + $0x80] sm:$0xff]  ;;  %v48_v60 = vld [vmem:[%s3316_s1 + $0x78] sm:$0xff] }
  0x12   :  { %410 = vmatprep.subr.mxu1 %v96_v39  ;;  %278 = vmatprep.subr.mxu0 %v69_v42  ;;  %v71_v59 = vld [vmem:[%s3316_s1 + $0x130] sm:$0xff]  ;;  %v70_v61 = vld [vmem:[%s3316_s1 + $0x128] sm:$0xff]  ;;  %v44_v62 = vld [vmem:[%s3316_s1 + $0x58] sm:$0xff] }
  0x13   :  { %411 = vmatpush1.msra.mxu1 %v95_v41  ;;  %279 = vmatpush1.msra.mxu0 %v68_v44  ;;  %v66_v63 = vld [vmem:[%s3316_s1 + $0x108] sm:$0xff]  ;;  %v43_v0 = vld [vmem:[%s3316_s1 + $0x50] sm:$0xff]  ;;  %v65_v1 = vld [vmem:[%s3316_s1 + $0x100] sm:$0xff] }
  0x14   :  { %412 = vmatprep.subr.mxu1 %v91_v43  ;;  %280 = vmatprep.subr.mxu0 %v64_v46  ;;  %v39_v2 = vld [vmem:[%s3316_s1 + $0x30] sm:$0xff]  ;;  %v61_v3 = vld [vmem:[%s3316_s1 + $0xe0] sm:$0xff]  ;;  %v38_v5 = vld [vmem:[%s3316_s1 + $0x28] sm:$0xff] }
  0x15   :  { %413 = vmatpush1.msra.mxu1 %v90_v45  ;;  %281 = vmatpush1.msra.mxu0 %v63_v48  ;;  %v60_v6 = vld [vmem:[%s3316_s1 + $0xd8] sm:$0xff]  ;;  %v34_v7 = vld [vmem:[%s3316_s1 + $0x8] sm:$0xff]  ;;  %v33_v9 = vld [vmem:[%s3316_s1] sm:$0xff] }
  0x16   :  { %414 = vmatprep.subr.mxu1 %v86_v47  ;;  %282 = vmatprep.subr.mxu0 %v59_v50  ;;  %v56_v8 = vld [vmem:[%s3316_s1 + $0xb8] sm:$0xff]  ;;  %v55_v11 = vld [vmem:[%s3316_s1 + $0xb0] sm:$0xff]  ;;  %v189_v12 = vld [vmem:[%s3316_s1 + $0x4e0] sm:$0xff] }
  0x17   :  { %415 = vmatpush1.msra.mxu1 %v85_v49  ;;  %283 = vmatpush1.msra.mxu0 %v58_v52  ;;  %v51_v13 = vld [vmem:[%s3316_s1 + $0x90] sm:$0xff]  ;;  %v188_v14 = vld [vmem:[%s3316_s1 + $0x4d8] sm:$0xff]  ;;  %v50_v15 = vld [vmem:[%s3316_s1 + $0x88] sm:$0xff] }
  0x18   :  { %416 = vmatprep.subr.mxu1 %v81_v51  ;;  %284 = vmatprep.subr.mxu0 %v54_v54  ;;  %v184_v16 = vld [vmem:[%s3316_s1 + $0x4b8] sm:$0xff]  ;;  %v46_v17 = vld [vmem:[%s3316_s1 + $0x68] sm:$0xff]  ;;  %v183_v18 = vld [vmem:[%s3316_s1 + $0x4b0] sm:$0xff] }
  0x19   :  { %417 = vmatpush1.msra.mxu1 %v80_v53  ;;  %285 = vmatpush1.msra.mxu0 %v53_v56  ;;  %v45_v19 = vld [vmem:[%s3316_s1 + $0x60] sm:$0xff]  ;;  %v179_v21 = vld [vmem:[%s3316_s1 + $0x490] sm:$0xff]  ;;  %v178_v24 = vld [vmem:[%s3316_s1 + $0x488] sm:$0xff] }
  0x1a   :  { %418 = vmatprep.subr.mxu1 %v76_v55  ;;  %286 = vmatprep.subr.mxu0 %v49_v58  ;;  %v41_v22 = vld [vmem:[%s3316_s1 + $0x40] sm:$0xff]  ;;  %v40_v25 = vld [vmem:[%s3316_s1 + $0x38] sm:$0xff]  ;;  %v174_v26 = vld [vmem:[%s3316_s1 + $0x468] sm:$0xff] }
  0x1b   :  { %419 = vmatpush1.msra.mxu1 %v75_v57  ;;  %287 = vmatpush1.msra.mxu0 %v48_v60  ;;  %v36_v27 = vld [vmem:[%s3316_s1 + $0x18] sm:$0xff]  ;;  %v173_v29 = vld [vmem:[%s3316_s1 + $0x460] sm:$0xff]  ;;  %v35_v30 = vld [vmem:[%s3316_s1 + $0x10] sm:$0xff] }
  0x1c   :  { %420 = vmatprep.subr.mxu1 %v71_v59  ;;  %288 = vmatprep.subr.mxu0 %v44_v62  ;;  %v169_v31 = vld [vmem:[%s3316_s1 + $0x440] sm:$0xff]  ;;  %v191_v32 = vld [vmem:[%s3316_s1 + $0x4f0] sm:$0xff]  ;;  %v168_v33 = vld [vmem:[%s3316_s1 + $0x438] sm:$0xff] }
  0x1d   :  { %421 = vmatpush1.msra.mxu1 %v70_v61  ;;  %289 = vmatpush1.msra.mxu0 %v43_v0  ;;  %v190_v34 = vld [vmem:[%s3316_s1 + $0x4e8] sm:$0xff]  ;;  %v164_v35 = vld [vmem:[%s3316_s1 + $0x418] sm:$0xff]  ;;  %v163_v37 = vld [vmem:[%s3316_s1 + $0x410] sm:$0xff] }
  0x1e   :  { %422 = vmatprep.subr.mxu1 %v66_v63  ;;  %290 = vmatprep.subr.mxu0 %v39_v2  ;;  %v186_v36 = vld [vmem:[%s3316_s1 + $0x4c8] sm:$0xff]  ;;  %v185_v38 = vld [vmem:[%s3316_s1 + $0x4c0] sm:$0xff]  ;;  %v159_v39 = vld [vmem:[%s3316_s1 + $0x3f0] sm:$0xff] }
  0x1f   :  { %423 = vmatpush1.msra.mxu1 %v65_v1  ;;  %291 = vmatpush1.msra.mxu0 %v38_v5  ;;  %v181_v40 = vld [vmem:[%s3316_s1 + $0x4a0] sm:$0xff]  ;;  %v158_v41 = vld [vmem:[%s3316_s1 + $0x3e8] sm:$0xff]  ;;  %v180_v42 = vld [vmem:[%s3316_s1 + $0x498] sm:$0xff]  ;;  %v2269_v5 = vrot.slane %v1955_v23, %v1944_v20 }
  0x20   :  { %424 = vmatprep.subr.mxu1 %v61_v3  ;;  %292 = vmatprep.subr.mxu0 %v34_v7  ;;  %v154_v43 = vld [vmem:[%s3316_s1 + $0x3c8] sm:$0xff]  ;;  %v176_v44 = vld [vmem:[%s3316_s1 + $0x478] sm:$0xff]  ;;  %v153_v45 = vld [vmem:[%s3316_s1 + $0x3c0] sm:$0xff] }
  0x21   :  { %425 = vmatpush1.msra.mxu1 %v60_v6  ;;  %293 = vmatpush1.msra.mxu0 %v33_v9  ;;  %v175_v46 = vld [vmem:[%s3316_s1 + $0x470] sm:$0xff]  ;;  %v149_v47 = vld [vmem:[%s3316_s1 + $0x3a0] sm:$0xff]  ;;  %v148_v49 = vld [vmem:[%s3316_s1 + $0x398] sm:$0xff] }
  0x22   :  { %426 = vmatprep.subr.mxu1 %v56_v8  ;;  %294 = vmatprep.subr.mxu0 %v189_v12  ;;  %v171_v48 = vld [vmem:[%s3316_s1 + $0x450] sm:$0xff]  ;;  %v170_v50 = vld [vmem:[%s3316_s1 + $0x448] sm:$0xff]  ;;  %v144_v51 = vld [vmem:[%s3316_s1 + $0x378] sm:$0xff] }
  0x23   :  { %427 = vmatpush1.msra.mxu1 %v55_v11  ;;  %295 = vmatpush2.msra.mxu0 %v188_v14  ;;  %v166_v52 = vld [vmem:[%s3316_s1 + $0x428] sm:$0xff]  ;;  %v143_v53 = vld [vmem:[%s3316_s1 + $0x370] sm:$0xff]  ;;  %v165_v54 = vld [vmem:[%s3316_s1 + $0x420] sm:$0xff] }
  0x24   :  { %428 = vmatprep.subr.mxu1 %v51_v13  ;;  %296 = vmatprep.subr.mxu0 %v184_v16  ;;  %v139_v55 = vld [vmem:[%s3316_s1 + $0x350] sm:$0xff]  ;;  %v161_v56 = vld [vmem:[%s3316_s1 + $0x400] sm:$0xff]  ;;  %v138_v57 = vld [vmem:[%s3316_s1 + $0x348] sm:$0xff] }
  0x25   :  { %429 = vmatpush1.msra.mxu1 %v50_v15  ;;  %297 = vmatpush2.msra.mxu0 %v183_v18  ;;  %v160_v58 = vld [vmem:[%s3316_s1 + $0x3f8] sm:$0xff]  ;;  %v134_v59 = vld [vmem:[%s3316_s1 + $0x328] sm:$0xff]  ;;  %v133_v61 = vld [vmem:[%s3316_s1 + $0x320] sm:$0xff]  ;;  %v2303_v15 = vcombine.high %v2269_v5, %v2269_v5 }
  0x26   :  { %430 = vmatprep.subr.mxu1 %v46_v17  ;;  %298 = vmatprep.subr.mxu0 %v179_v21  ;;  %v156_v60 = vld [vmem:[%s3316_s1 + $0x3d8] sm:$0xff]  ;;  %v155_v62 = vld [vmem:[%s3316_s1 + $0x3d0] sm:$0xff]  ;;  %v129_v63 = vld [vmem:[%s3316_s1 + $0x300] sm:$0xff] }
  0x27   :  { %431 = vmatpush1.msra.mxu1 %v45_v19  ;;  %299 = vmatpush2.msra.mxu0 %v178_v24  ;;  %v151_v0 = vld [vmem:[%s3316_s1 + $0x3b0] sm:$0xff]  ;;  %v128_v1 = vld [vmem:[%s3316_s1 + $0x2f8] sm:$0xff]  ;;  %v150_v2 = vld [vmem:[%s3316_s1 + $0x3a8] sm:$0xff] }
  0x28   :  { %432 = vmatprep.subr.mxu1 %v41_v22  ;;  %300 = vmatprep.subr.mxu0 %v174_v26  ;;  %v124_v3 = vld [vmem:[%s3316_s1 + $0x2d8] sm:$0xff]  ;;  %v146_v6 = vld [vmem:[%s3316_s1 + $0x388] sm:$0xff]  ;;  %v123_v7 = vld [vmem:[%s3316_s1 + $0x2d0] sm:$0xff] }
  0x29   :  { %433 = vmatpush1.msra.mxu1 %v40_v25  ;;  %301 = vmatpush2.msra.mxu0 %v173_v29  ;;  %v145_v8 = vld [vmem:[%s3316_s1 + $0x380] sm:$0xff]  ;;  %v119_v20 = vld [vmem:[%s3316_s1 + $0x2b0] sm:$0xff]  ;;  %v118_v9 = vld [vmem:[%s3316_s1 + $0x2a8] sm:$0xff] }
  0x2a   :  { %434 = vmatprep.subr.mxu1 %v36_v27  ;;  %302 = vmatprep.subr.mxu0 %v169_v31  ;;  %v141_v23 = vld [vmem:[%s3316_s1 + $0x360] sm:$0xff]  ;;  %v140_v11 = vld [vmem:[%s3316_s1 + $0x358] sm:$0xff]  ;;  %v114_v12 = vld [vmem:[%s3316_s1 + $0x288] sm:$0xff] }
  0x2b   :  { %435 = vmatpush1.msra.mxu1 %v35_v30  ;;  %303 = vmatpush2.msra.mxu0 %v168_v33  ;;  %v136_v13 = vld [vmem:[%s3316_s1 + $0x338] sm:$0xff]  ;;  %v113_v14 = vld [vmem:[%s3316_s1 + $0x280] sm:$0xff]  ;;  %v135_v16 = vld [vmem:[%s3316_s1 + $0x330] sm:$0xff] }
  0x2c   :  { %436 = vmatprep.subr.mxu1 %v191_v32  ;;  %304 = vmatprep.subr.mxu0 %v164_v35  ;;  %v131_v17 = vld [vmem:[%s3316_s1 + $0x310] sm:$0xff]  ;;  %v192_v18 = vld [vmem:[%s3316_s1 + $0x4f8] sm:$0xff]  ;;  %v130_v19 = vld [vmem:[%s3316_s1 + $0x308] sm:$0xff] }
  0x2d   :  { %437 = vmatpush2.msra.mxu1 %v190_v34  ;;  %305 = vmatpush2.msra.mxu0 %v163_v37  ;;  %v112_v21 = vld [vmem:[%s3316_s1 + $0x278] sm:$0xff]  ;;  %v126_v22 = vld [vmem:[%s3316_s1 + $0x2e8] sm:$0xff]  ;;  %v187_v24 = vld [vmem:[%s3316_s1 + $0x4d0] sm:$0xff] }
  0x2e   :  { %438 = vmatprep.subr.mxu1 %v186_v36  ;;  %306 = vmatprep.subr.mxu0 %v159_v39  ;;  %v125_v25 = vld [vmem:[%s3316_s1 + $0x2e0] sm:$0xff]  ;;  %v107_v26 = vld [vmem:[%s3316_s1 + $0x250] sm:$0xff]  ;;  %v182_v29 = vld [vmem:[%s3316_s1 + $0x4a8] sm:$0xff] }
  0x2f   :  { %439 = vmatpush2.msra.mxu1 %v185_v38  ;;  %307 = vmatpush2.msra.mxu0 %v158_v41  ;;  %v121_v27 = vld [vmem:[%s3316_s1 + $0x2c0] sm:$0xff]  ;;  %v120_v30 = vld [vmem:[%s3316_s1 + $0x2b8] sm:$0xff]  ;;  %v102_v31 = vld [vmem:[%s3316_s1 + $0x228] sm:$0xff] }
  0x30   :  { %440 = vmatprep.subr.mxu1 %v181_v40  ;;  %308 = vmatprep.subr.mxu0 %v154_v43  ;;  %v116_v32 = vld [vmem:[%s3316_s1 + $0x298] sm:$0xff]  ;;  %v177_v33 = vld [vmem:[%s3316_s1 + $0x480] sm:$0xff]  ;;  %v115_v34 = vld [vmem:[%s3316_s1 + $0x290] sm:$0xff] }
  0x31   :  { %441 = vmatpush2.msra.mxu1 %v180_v42  ;;  %309 = vmatpush2.msra.mxu0 %v153_v45  ;;  %v97_v35 = vld [vmem:[%s3316_s1 + $0x200] sm:$0xff]  ;;  %v211_v36 = vld [vmem:[%s3316_s1 + $0x590] sm:$0xff]  ;;  %v172_v37 = vld [vmem:[%s3316_s1 + $0x458] sm:$0xff] }
  0x32   :  { %442 = vmatprep.subr.mxu1 %v176_v44  ;;  %310 = vmatprep.subr.mxu0 %v149_v47  ;;  %v210_v38 = vld [vmem:[%s3316_s1 + $0x588] sm:$0xff]  ;;  %v92_v39 = vld [vmem:[%s3316_s1 + $0x1d8] sm:$0xff]  ;;  %v167_v41 = vld [vmem:[%s3316_s1 + $0x430] sm:$0xff] }
  0x33   :  { %443 = vmatpush2.msra.mxu1 %v175_v46  ;;  %311 = vmatpush2.msra.mxu0 %v148_v49  ;;  %v206_v40 = vld [vmem:[%s3316_s1 + $0x568] sm:$0xff]  ;;  %v205_v42 = vld [vmem:[%s3316_s1 + $0x560] sm:$0xff]  ;;  %v87_v43 = vld [vmem:[%s3316_s1 + $0x1b0] sm:$0xff] }
  0x34   :  { %444 = vmatprep.subr.mxu1 %v171_v48  ;;  %312 = vmatprep.subr.mxu0 %v144_v51  ;;  %v201_v44 = vld [vmem:[%s3316_s1 + $0x540] sm:$0xff]  ;;  %v162_v45 = vld [vmem:[%s3316_s1 + $0x408] sm:$0xff]  ;;  %v200_v46 = vld [vmem:[%s3316_s1 + $0x538] sm:$0xff] }
  0x35   :  { %445 = vmatpush2.msra.mxu1 %v170_v50  ;;  %313 = vmatpush2.msra.mxu0 %v143_v53  ;;  %v82_v47 = vld [vmem:[%s3316_s1 + $0x188] sm:$0xff]  ;;  %v196_v48 = vld [vmem:[%s3316_s1 + $0x518] sm:$0xff]  ;;  %v157_v49 = vld [vmem:[%s3316_s1 + $0x3e0] sm:$0xff] }
  0x36   :  { %446 = vmatprep.subr.mxu1 %v166_v52  ;;  %314 = vmatprep.subr.mxu0 %v139_v55  ;;  %v195_v50 = vld [vmem:[%s3316_s1 + $0x510] sm:$0xff]  ;;  %v77_v51 = vld [vmem:[%s3316_s1 + $0x160] sm:$0xff]  ;;  %v152_v52 = vld [vmem:[%s3316_s1 + $0x3b8] sm:$0xff] }
  0x37   :  { %447 = vmatpush2.msra.mxu1 %v165_v54  ;;  %315 = vmatpush2.msra.mxu0 %v138_v57  ;;  %v72_v53 = vld [vmem:[%s3316_s1 + $0x138] sm:$0xff]  ;;  %v147_v55 = vld [vmem:[%s3316_s1 + $0x390] sm:$0xff] }
  0x38   :  { %448 = vmatprep.subr.mxu1 %v161_v56  ;;  %316 = vmatprep.subr.mxu0 %v134_v59  ;;  %v212_v54 = vld [vmem:[%s3316_s1 + $0x598] sm:$0xff]  ;;  %v67_v56 = vld [vmem:[%s3316_s1 + $0x110] sm:$0xff]  ;;  %v62_v59 = vld [vmem:[%s3316_s1 + $0xe8] sm:$0xff] }
  0x39   :  { %449 = vmatpush2.msra.mxu1 %v160_v58  ;;  %317 = vmatpush2.msra.mxu0 %v133_v61  ;;  %v207_v57 = vld [vmem:[%s3316_s1 + $0x570] sm:$0xff]  ;;  %v142_v58 = vld [vmem:[%s3316_s1 + $0x368] sm:$0xff]  ;;  %v137_v61 = vld [vmem:[%s3316_s1 + $0x340] sm:$0xff] }
  0x3a   :  { %450 = vmatprep.subr.mxu1 %v156_v60  ;;  %318 = vmatprep.subr.mxu0 %v129_v63  ;;  %v202_v60 = vld [vmem:[%s3316_s1 + $0x548] sm:$0xff]  ;;  %v197_v63 = vld [vmem:[%s3316_s1 + $0x520] sm:$0xff] }
  0x3b   :  { %451 = vmatpush2.msra.mxu1 %v155_v62  ;;  %319 = vmatpush2.msra.mxu0 %v128_v1  ;;  %v57_v62 = vld [vmem:[%s3316_s1 + $0xc0] sm:$0xff] }
  0x3c   :  { %452 = vmatprep.subr.mxu1 %v151_v0  ;;  %320 = vmatprep.subr.mxu0 %v124_v3  ;;  %v132_v0 = vld [vmem:[%s3316_s1 + $0x318] sm:$0xff]  ;;  %v762_v1 = vld [vmem:[%s3318_s3 + $0x260] sm:$0xff] }
  0x3d   :  { %453 = vmatpush2.msra.mxu1 %v150_v2  ;;  %321 = vmatpush2.msra.mxu0 %v123_v7  ;;  %v52_v2 = vld [vmem:[%s3316_s1 + $0x98] sm:$0xff] }
  0x3e   :  { %454 = vmatprep.subr.mxu1 %v146_v6  ;;  %322 = vmatprep.subr.mxu0 %v119_v20  ;;  %v761_v3 = vld [vmem:[%s3318_s3 + $0x258] sm:$0xff]  ;;  %v127_v6 = vld [vmem:[%s3316_s1 + $0x2f0] sm:$0xff] }
  0x3f   :  { %455 = vmatpush2.msra.mxu1 %v145_v8  ;;  %323 = vmatpush2.msra.mxu0 %v118_v9  ;;  %v757_v7 = vld [vmem:[%s3318_s3 + $0x238] sm:$0xff]  ;;  %v47_v8 = vld [vmem:[%s3316_s1 + $0x70] sm:$0xff] }
  0x40   :  { %456 = vmatprep.subr.mxu1 %v141_v23  ;;  %324 = vmatprep.subr.mxu0 %v114_v12  ;;  %v756_v20 = vld [vmem:[%s3318_s3 + $0x230] sm:$0xff]  ;;  %v122_v23 = vld [vmem:[%s3316_s1 + $0x2c8] sm:$0xff] }
  0x41   :  { %457 = vmatpush2.msra.mxu1 %v140_v11  ;;  %325 = vmatpush2.msra.mxu0 %v113_v14  ;;  %v752_v9 = vld [vmem:[%s3318_s3 + $0x210] sm:$0xff]  ;;  %v42_v11 = vld [vmem:[%s3316_s1 + $0x48] sm:$0xff] }
  0x42   :  { %458 = vmatprep.subr.mxu1 %v136_v13  ;;  %326 = vmatprep.mubr.f32.mxu0 %v2303_v15  ;;  %v751_v12 = vld [vmem:[%s3318_s3 + $0x208] sm:$0xff]  ;;  %v117_v13 = vld [vmem:[%s3316_s1 + $0x2a0] sm:$0xff] }
  0x43   :  { %459 = vmatpush2.msra.mxu1 %v135_v16  ;;  %327 = vmatmul.mubr.f32.vlgmr.msra.gmra.mxu0 %v2269_v5  ;;  %v747_v14 = vld [vmem:[%s3318_s3 + $0x1e8] sm:$0xff]  ;;  %v37_v16 = vld [vmem:[%s3316_s1 + $0x20] sm:$0xff] }
  0x44   :  { %460 = vmatprep.subr.mxu1 %v131_v17  ;;  %1641 = vmatprep.subr.mxu0 %v192_v18  ;;  %v746_v17 = vld [vmem:[%s3318_s3 + $0x1e0] sm:$0xff] }
  0x45   :  { %461 = vmatpush2.msra.mxu1 %v130_v19  ;;  %1642 = vmatpush3.msra.mxu0 %v112_v21  ;;  %v742_v18 = vld [vmem:[%s3318_s3 + $0x1c0] sm:$0xff]  ;;  %v741_v21 = vld [vmem:[%s3318_s3 + $0x1b8] sm:$0xff] }
  0x46   :  { %462 = vmatprep.subr.mxu1 %v126_v22  ;;  %1643 = vmatprep.subr.mxu0 %v187_v24  ;;  %v862_v19 = vld [vmem:[%s3318_s3 + $0x580] sm:$0xff]  ;;  %v861_v22 = vld [vmem:[%s3318_s3 + $0x578] sm:$0xff] }
  0x47   :  { %463 = vmatpush2.msra.mxu1 %v125_v25  ;;  %1644 = vmatpush3.msra.mxu0 %v107_v26  ;;  %v737_v24 = vld [vmem:[%s3318_s3 + $0x198] sm:$0xff]  ;;  %v736_v26 = vld [vmem:[%s3318_s3 + $0x190] sm:$0xff] }
  0x48   :  { %464 = vmatprep.subr.mxu1 %v121_v27  ;;  %1645 = vmatprep.subr.mxu0 %v182_v29  ;;  %v857_v25 = vld [vmem:[%s3318_s3 + $0x558] sm:$0xff]  ;;  %v856_v27 = vld [vmem:[%s3318_s3 + $0x550] sm:$0xff] }
  0x49   :  { %465 = vmatpush2.msra.mxu1 %v120_v30  ;;  %1646 = vmatpush3.msra.mxu0 %v102_v31  ;;  %v732_v29 = vld [vmem:[%s3318_s3 + $0x170] sm:$0xff]  ;;  %v731_v31 = vld [vmem:[%s3318_s3 + $0x168] sm:$0xff] }
  0x4a   :  { %466 = vmatprep.subr.mxu1 %v116_v32  ;;  %1647 = vmatprep.subr.mxu0 %v177_v33  ;;  %v852_v30 = vld [vmem:[%s3318_s3 + $0x530] sm:$0xff]  ;;  %v851_v32 = vld [vmem:[%s3318_s3 + $0x528] sm:$0xff] }
  0x4b   :  { %467 = vmatpush2.msra.mxu1 %v115_v34  ;;  %468 = vmatprep.mubr.f32.mxu1 %v2303_v15  ;;  %v727_v33 = vld [vmem:[%s3318_s3 + $0x148] sm:$0xff] }
  0x4c   :  { %1648 = vmatpush3.msra.mxu0 %v97_v35  ;;  %469 = vmatmul.mubr.f32.vlgmr.msra.gmra.mxu1 %v2269_v5  ;;  %v847_v34 = vld [vmem:[%s3318_s3 + $0x508] sm:$0xff]  ;;  %v726_v35 = vld [vmem:[%s3318_s3 + $0x140] sm:$0xff] }
  0x4d   :  { %499 = vmatprep.subr.mxu1 %v211_v36  ;;  %1649 = vmatprep.subr.mxu0 %v172_v37  ;;  %v846_v36 = vld [vmem:[%s3318_s3 + $0x500] sm:$0xff] }
  0x4e   :  { %500 = vmatpush1.msra.mxu1 %v210_v38  ;;  %1650 = vmatpush3.msra.mxu0 %v92_v39  ;;  %v722_v37 = vld [vmem:[%s3318_s3 + $0x120] sm:$0xff]  ;;  %v764_v38 = vld [vmem:[%s3318_s3 + $0x270] sm:$0xff]  ;;  %v721_v39 = vld [vmem:[%s3318_s3 + $0x118] sm:$0xff] }
  0x4f   :  { %501 = vmatprep.subr.mxu1 %v206_v40  ;;  %1651 = vmatprep.subr.mxu0 %v167_v41  ;;  %v763_v40 = vld [vmem:[%s3318_s3 + $0x268] sm:$0xff]  ;;  %v717_v41 = vld [vmem:[%s3318_s3 + $0xf8] sm:$0xff] }
  0x50   :  { %502 = vmatpush1.msra.mxu1 %v205_v42  ;;  %1652 = vmatpush3.msra.mxu0 %v87_v43  ;;  %v759_v42 = vld [vmem:[%s3318_s3 + $0x248] sm:$0xff]  ;;  %v716_v43 = vld [vmem:[%s3318_s3 + $0xf0] sm:$0xff] }
  0x51   :  { %503 = vmatprep.subr.mxu1 %v201_v44  ;;  %1653 = vmatprep.subr.mxu0 %v162_v45  ;;  %v758_v44 = vld [vmem:[%s3318_s3 + $0x240] sm:$0xff]  ;;  %v712_v45 = vld [vmem:[%s3318_s3 + $0xd0] sm:$0xff] }
  0x52   :  { %504 = vmatpush1.msra.mxu1 %v200_v46  ;;  %1654 = vmatpush3.msra.mxu0 %v82_v47  ;;  %v754_v46 = vld [vmem:[%s3318_s3 + $0x220] sm:$0xff]  ;;  %v711_v47 = vld [vmem:[%s3318_s3 + $0xc8] sm:$0xff] }
  0x53   :  { %505 = vmatprep.subr.mxu1 %v196_v48  ;;  %1655 = vmatprep.subr.mxu0 %v157_v49  ;;  %v753_v48 = vld [vmem:[%s3318_s3 + $0x218] sm:$0xff]  ;;  %v707_v49 = vld [vmem:[%s3318_s3 + $0xa8] sm:$0xff] }
  0x54   :  { %506 = vmatpush1.msra.mxu1 %v195_v50  ;;  %539 = vmatprep.mubr.f32.mxu1 %v1845_v4  ;;  %v749_v50 = vld [vmem:[%s3318_s3 + $0x1f8] sm:$0xff] }
  0x55   :  { %1656 = vmatpush3.msra.mxu0 %v77_v51  ;;  %1633 = vmatmul.mubr.msk.f32.vlgmr.msra.gmra.mxu1 %vm259_vm0, %v1969_v28  ;;  %v706_v51 = vld [vmem:[%s3318_s3 + $0xa0] sm:$0xff] }
  0x56   :  { %1657 = vmatprep.subr.mxu0 %v152_v52  ;;  %1800 = vmatprep.subr.mxu1 %v1845_v4  ;;  %v748_v52 = vld [vmem:[%s3318_s3 + $0x1f0] sm:$0xff] }
  0x57   :  { %1658 = vmatpush3.msra.mxu0 %v72_v53  ;;  %1801 = vmatpush3.msra.mxu1 %v212_v54  ;;  %v702_v53 = vld [vmem:[%s3318_s3 + $0x80] sm:$0xff]  ;;  %v744_v54 = vld [vmem:[%s3318_s3 + $0x1d0] sm:$0xff] }
  0x58   :  { %1659 = vmatprep.subr.mxu0 %v147_v55  ;;  %1802 = vmatprep.subr.mxu1 %v1845_v4  ;;  %v701_v55 = vld [vmem:[%s3318_s3 + $0x78] sm:$0xff] }
  0x59   :  { %1660 = vmatpush3.msra.mxu0 %v67_v56  ;;  %1803 = vmatpush3.msra.mxu1 %v207_v57  ;;  %v743_v56 = vld [vmem:[%s3318_s3 + $0x1c8] sm:$0xff]  ;;  %v697_v57 = vld [vmem:[%s3318_s3 + $0x58] sm:$0xff] }
  0x5a   :  { %1661 = vmatprep.subr.mxu0 %v142_v58  ;;  %1804 = vmatprep.subr.mxu1 %v1845_v4  ;;  %v739_v58 = vld [vmem:[%s3318_s3 + $0x1a8] sm:$0xff] }
  0x5b   :  { %1662 = vmatpush3.msra.mxu0 %v62_v59  ;;  %1805 = vmatpush3.msra.mxu1 %v202_v60  ;;  %v696_v59 = vld [vmem:[%s3318_s3 + $0x50] sm:$0xff]  ;;  %v738_v60 = vld [vmem:[%s3318_s3 + $0x1a0] sm:$0xff] }
  0x5c   :  { %1663 = vmatprep.subr.mxu0 %v137_v61  ;;  %1806 = vmatprep.subr.mxu1 %v1845_v4  ;;  %v692_v61 = vld [vmem:[%s3318_s3 + $0x30] sm:$0xff] }
  0x5d   :  { %1664 = vmatpush3.msra.mxu0 %v57_v62  ;;  %1807 = vmatpush3.msra.mxu1 %v197_v63  ;;  %v734_v62 = vld [vmem:[%s3318_s3 + $0x180] sm:$0xff]  ;;  %v691_v63 = vld [vmem:[%s3318_s3 + $0x28] sm:$0xff] }
  0x5e   :  { %1808 = vmatprep.mubr.msk.f32.mxu1 %vm1847_vm1, %v1845_v4  ;;  %1665 = vmatprep.subr.mxu0 %v132_v0  ;;  %v733_v0 = vld [vmem:[%s3318_s3 + $0x178] sm:$0xff] }
  0x5f   :  { %1809 = vmatmul.mubr.msk.f32.vlgmr.msra.gmra.mxu1 %vm259_vm0, %v1969_v28  ;;  %893 = vmatprep.subr.mxu1 %v762_v1  ;;  %v687_v1 = vld [vmem:[%s3318_s3 + $0x8] sm:$0xff] }
  0x60   :  { %1666 = vmatpush3.msra.mxu0 %v52_v2  ;;  %894 = vmatpush1.msra.mxu1 %v761_v3  ;;  %v729_v2 = vld [vmem:[%s3318_s3 + $0x158] sm:$0xff]  ;;  %v686_v3 = vld [vmem:[%s3318_s3] sm:$0xff] }
  0x61   :  { %1667 = vmatprep.subr.mxu0 %v127_v6  ;;  %895 = vmatprep.subr.mxu1 %v757_v7  ;;  %v728_v6 = vld [vmem:[%s3318_s3 + $0x150] sm:$0xff]  ;;  %v842_v7 = vld [vmem:[%s3318_s3 + $0x4e0] sm:$0xff] }
  0x62   :  { %1668 = vmatpush3.msra.mxu0 %v47_v8  ;;  %896 = vmatpush1.msra.mxu1 %v756_v20  ;;  %v724_v8 = vld [vmem:[%s3318_s3 + $0x130] sm:$0xff]  ;;  %v841_v20 = vld [vmem:[%s3318_s3 + $0x4d8] sm:$0xff] }
  0x63   :  { %1669 = vmatprep.subr.mxu0 %v122_v23  ;;  %897 = vmatprep.subr.mxu1 %v752_v9  ;;  %v723_v23 = vld [vmem:[%s3318_s3 + $0x128] sm:$0xff]  ;;  %v837_v9 = vld [vmem:[%s3318_s3 + $0x4b8] sm:$0xff] }
  0x64   :  { %1670 = vmatpush3.msra.mxu0 %v42_v11  ;;  %898 = vmatpush1.msra.mxu1 %v751_v12  ;;  %v719_v11 = vld [vmem:[%s3318_s3 + $0x108] sm:$0xff]  ;;  %v836_v12 = vld [vmem:[%s3318_s3 + $0x4b0] sm:$0xff] }
  0x65   :  { %1671 = vmatprep.subr.mxu0 %v117_v13  ;;  %899 = vmatprep.subr.mxu1 %v747_v14  ;;  %v718_v13 = vld [vmem:[%s3318_s3 + $0x100] sm:$0xff]  ;;  %v832_v14 = vld [vmem:[%s3318_s3 + $0x490] sm:$0xff] }
  0x66   :  { %1672 = vmatpush3.msra.mxu0 %v37_v16  ;;  %610 = vmatprep.mubr.f32.mxu0 %v2303_v15  ;;  %v714_v16 = vld [vmem:[%s3318_s3 + $0xe0] sm:$0xff] }
  0x67   :  { %900 = vmatpush1.msra.mxu1 %v746_v17  ;;  %611 = vmatmul.mubr.f32.vlgmr.msra.gmra.mxu0 %v2269_v5  ;;  %v831_v17 = vld [vmem:[%s3318_s3 + $0x488] sm:$0xff] }
  0x68   :  { %901 = vmatprep.subr.mxu1 %v742_v18  ;;  %988 = vmatprep.subr.mxu0 %v862_v19  ;;  %v713_v18 = vld [vmem:[%s3318_s3 + $0xd8] sm:$0xff]  ;;  %v827_v19 = vld [vmem:[%s3318_s3 + $0x468] sm:$0xff] }
  0x69   :  { %902 = vmatpush1.msra.mxu1 %v741_v21  ;;  %989 = vmatpush1.msra.mxu0 %v861_v22  ;;  %v709_v21 = vld [vmem:[%s3318_s3 + $0xb8] sm:$0xff]  ;;  %v826_v22 = vld [vmem:[%s3318_s3 + $0x460] sm:$0xff] }
  0x6a   :  { %903 = vmatprep.subr.mxu1 %v737_v24  ;;  %990 = vmatprep.subr.mxu0 %v857_v25  ;;  %v708_v24 = vld [vmem:[%s3318_s3 + $0xb0] sm:$0xff]  ;;  %v822_v25 = vld [vmem:[%s3318_s3 + $0x440] sm:$0xff] }
  0x6b   :  { %904 = vmatpush1.msra.mxu1 %v736_v26  ;;  %991 = vmatpush1.msra.mxu0 %v856_v27  ;;  %v704_v26 = vld [vmem:[%s3318_s3 + $0x90] sm:$0xff]  ;;  %v821_v27 = vld [vmem:[%s3318_s3 + $0x438] sm:$0xff] }
  0x6c   :  { %905 = vmatprep.subr.mxu1 %v732_v29  ;;  %992 = vmatprep.subr.mxu0 %v852_v30  ;;  %v703_v29 = vld [vmem:[%s3318_s3 + $0x88] sm:$0xff]  ;;  %v817_v30 = vld [vmem:[%s3318_s3 + $0x418] sm:$0xff] }
  0x6d   :  { %906 = vmatpush1.msra.mxu1 %v731_v31  ;;  %993 = vmatpush1.msra.mxu0 %v851_v32  ;;  %v699_v31 = vld [vmem:[%s3318_s3 + $0x68] sm:$0xff]  ;;  %v816_v32 = vld [vmem:[%s3318_s3 + $0x410] sm:$0xff] }
  0x6e   :  { %907 = vmatprep.subr.mxu1 %v727_v33  ;;  %994 = vmatprep.subr.mxu0 %v847_v34  ;;  %v698_v33 = vld [vmem:[%s3318_s3 + $0x60] sm:$0xff]  ;;  %v812_v34 = vld [vmem:[%s3318_s3 + $0x3f0] sm:$0xff] }
  0x6f   :  { %908 = vmatpush1.msra.mxu1 %v726_v35  ;;  %995 = vmatpush1.msra.mxu0 %v846_v36  ;;  %v694_v35 = vld [vmem:[%s3318_s3 + $0x40] sm:$0xff]  ;;  %v811_v36 = vld [vmem:[%s3318_s3 + $0x3e8] sm:$0xff] }
  0x70   :  { %909 = vmatprep.subr.mxu1 %v722_v37  ;;  %1028 = vmatprep.mubr.f32.mxu0 %v1845_v4  ;;  %v693_v37 = vld [vmem:[%s3318_s3 + $0x38] sm:$0xff] }
  0x71   :  { %1035 = vmatprep.subr.mxu0 %v764_v38  ;;  %910 = vmatpush1.msra.mxu1 %v721_v39  ;;  %v807_v38 = vld [vmem:[%s3318_s3 + $0x3c8] sm:$0xff]  ;;  %v689_v39 = vld [vmem:[%s3318_s3 + $0x18] sm:$0xff] }
  0x72   :  { %1635 = vmatmul.mubr.msk.f32.vlgmr.msra.gmra.mxu0 %vm259_vm0, %v1969_v28  ;;  %911 = vmatprep.subr.mxu1 %v717_v41  ;;  %v688_v41 = vld [vmem:[%s3318_s3 + $0x10] sm:$0xff] }
  0x73   :  { %1036 = vmatpush1.msra.mxu0 %v763_v40  ;;  %912 = vmatpush1.msra.mxu1 %v716_v43  ;;  %v806_v40 = vld [vmem:[%s3318_s3 + $0x3c0] sm:$0xff]  ;;  %v844_v43 = vld [vmem:[%s3318_s3 + $0x4f0] sm:$0xff] }
  0x74   :  { %1037 = vmatprep.subr.mxu0 %v759_v42  ;;  %913 = vmatprep.subr.mxu1 %v712_v45  ;;  %v802_v42 = vld [vmem:[%s3318_s3 + $0x3a0] sm:$0xff]  ;;  %v843_v45 = vld [vmem:[%s3318_s3 + $0x4e8] sm:$0xff] }
  0x75   :  { %1038 = vmatpush1.msra.mxu0 %v758_v44  ;;  %914 = vmatpush1.msra.mxu1 %v711_v47  ;;  %v801_v44 = vld [vmem:[%s3318_s3 + $0x398] sm:$0xff]  ;;  %v839_v47 = vld [vmem:[%s3318_s3 + $0x4c8] sm:$0xff] }
  0x76   :  { %1039 = vmatprep.subr.mxu0 %v754_v46  ;;  %915 = vmatprep.subr.mxu1 %v707_v49  ;;  %v797_v46 = vld [vmem:[%s3318_s3 + $0x378] sm:$0xff]  ;;  %v838_v49 = vld [vmem:[%s3318_s3 + $0x4c0] sm:$0xff] }
  0x77   :  { %1040 = vmatpush1.msra.mxu0 %v753_v48  ;;  %916 = vmatpush1.msra.mxu1 %v706_v51  ;;  %v796_v48 = vld [vmem:[%s3318_s3 + $0x370] sm:$0xff]  ;;  %v834_v51 = vld [vmem:[%s3318_s3 + $0x4a0] sm:$0xff] }
  0x78   :  { %1041 = vmatprep.subr.mxu0 %v749_v50  ;;  %917 = vmatprep.subr.mxu1 %v702_v53  ;;  %v792_v50 = vld [vmem:[%s3318_s3 + $0x350] sm:$0xff]  ;;  %v833_v53 = vld [vmem:[%s3318_s3 + $0x498] sm:$0xff] }
  0x79   :  { %1042 = vmatpush1.msra.mxu0 %v748_v52  ;;  %918 = vmatpush1.msra.mxu1 %v701_v55  ;;  %v791_v52 = vld [vmem:[%s3318_s3 + $0x348] sm:$0xff]  ;;  %v829_v55 = vld [vmem:[%s3318_s3 + $0x478] sm:$0xff] }
  0x7a   :  { %1043 = vmatprep.subr.mxu0 %v744_v54  ;;  %919 = vmatprep.subr.mxu1 %v697_v57  ;;  %v787_v54 = vld [vmem:[%s3318_s3 + $0x328] sm:$0xff]  ;;  %v828_v57 = vld [vmem:[%s3318_s3 + $0x470] sm:$0xff] }
  0x7b   :  { %1044 = vmatpush1.msra.mxu0 %v743_v56  ;;  %920 = vmatpush1.msra.mxu1 %v696_v59  ;;  %v786_v56 = vld [vmem:[%s3318_s3 + $0x320] sm:$0xff]  ;;  %v824_v59 = vld [vmem:[%s3318_s3 + $0x450] sm:$0xff] }
  0x7c   :  { %1045 = vmatprep.subr.mxu0 %v739_v58  ;;  %921 = vmatprep.subr.mxu1 %v692_v61  ;;  %v782_v58 = vld [vmem:[%s3318_s3 + $0x300] sm:$0xff]  ;;  %v823_v61 = vld [vmem:[%s3318_s3 + $0x448] sm:$0xff] }
  0x7d   :  { %1046 = vmatpush1.msra.mxu0 %v738_v60  ;;  %922 = vmatpush1.msra.mxu1 %v691_v63  ;;  %v781_v60 = vld [vmem:[%s3318_s3 + $0x2f8] sm:$0xff]  ;;  %v819_v63 = vld [vmem:[%s3318_s3 + $0x428] sm:$0xff] }
  0x7e   :  { %1047 = vmatprep.subr.mxu0 %v734_v62  ;;  %923 = vmatprep.subr.mxu1 %v687_v1  ;;  %v777_v62 = vld [vmem:[%s3318_s3 + $0x2d8] sm:$0xff]  ;;  %v818_v1 = vld [vmem:[%s3318_s3 + $0x420] sm:$0xff] }
  0x7f   :  { %1048 = vmatpush1.msra.mxu0 %v733_v0  ;;  %924 = vmatpush1.msra.mxu1 %v686_v3  ;;  %v776_v0 = vld [vmem:[%s3318_s3 + $0x2d0] sm:$0xff]  ;;  %v814_v3 = vld [vmem:[%s3318_s3 + $0x400] sm:$0xff] }
  0x80   :  { %1049 = vmatprep.subr.mxu0 %v729_v2  ;;  %925 = vmatprep.subr.mxu1 %v842_v7  ;;  %v772_v2 = vld [vmem:[%s3318_s3 + $0x2b0] sm:$0xff]  ;;  %v813_v7 = vld [vmem:[%s3318_s3 + $0x3f8] sm:$0xff] }
  0x81   :  { %1050 = vmatpush1.msra.mxu0 %v728_v6  ;;  %926 = vmatpush2.msra.mxu1 %v841_v20  ;;  %v771_v6 = vld [vmem:[%s3318_s3 + $0x2a8] sm:$0xff]  ;;  %v809_v20 = vld [vmem:[%s3318_s3 + $0x3d8] sm:$0xff] }
  0x82   :  { %1051 = vmatprep.subr.mxu0 %v724_v8  ;;  %927 = vmatprep.subr.mxu1 %v837_v9  ;;  %v767_v8 = vld [vmem:[%s3318_s3 + $0x288] sm:$0xff]  ;;  %v808_v9 = vld [vmem:[%s3318_s3 + $0x3d0] sm:$0xff] }
  0x83   :  { %1052 = vmatpush1.msra.mxu0 %v723_v23  ;;  %928 = vmatpush2.msra.mxu1 %v836_v12  ;;  %v766_v23 = vld [vmem:[%s3318_s3 + $0x280] sm:$0xff]  ;;  %v864_v12 = vld [vmem:[%s3318_s3 + $0x590] sm:$0xff] }
  0x84   :  { %1053 = vmatprep.subr.mxu0 %v719_v11  ;;  %929 = vmatprep.subr.mxu1 %v832_v14  ;;  %v804_v11 = vld [vmem:[%s3318_s3 + $0x3b0] sm:$0xff]  ;;  %v863_v14 = vld [vmem:[%s3318_s3 + $0x588] sm:$0xff] }
  0x85   :  { %1054 = vmatpush1.msra.mxu0 %v718_v13  ;;  %930 = vmatpush2.msra.mxu1 %v831_v17  ;;  %v803_v13 = vld [vmem:[%s3318_s3 + $0x3a8] sm:$0xff] }
  0x86   :  { %1055 = vmatprep.subr.mxu0 %v714_v16  ;;  %931 = vmatprep.subr.mxu1 %v827_v19  ;;  %v799_v16 = vld [vmem:[%s3318_s3 + $0x388] sm:$0xff]  ;;  %v858_v19 = vld [vmem:[%s3318_s3 + $0x560] sm:$0xff] }
  0x87   :  { %1056 = vmatpush1.msra.mxu0 %v713_v18  ;;  %932 = vmatpush2.msra.mxu1 %v826_v22  ;;  %v859_v17 = vld [vmem:[%s3318_s3 + $0x568] sm:$0xff]  ;;  %v798_v18 = vld [vmem:[%s3318_s3 + $0x380] sm:$0xff] }
  0x88   :  { %1057 = vmatprep.subr.mxu0 %v709_v21  ;;  %933 = vmatprep.subr.mxu1 %v822_v25  ;;  %v794_v21 = vld [vmem:[%s3318_s3 + $0x360] sm:$0xff]  ;;  %v853_v25 = vld [vmem:[%s3318_s3 + $0x538] sm:$0xff] }
  0x89   :  { %1058 = vmatpush1.msra.mxu0 %v708_v24  ;;  %934 = vmatpush2.msra.mxu1 %v821_v27  ;;  %v854_v22 = vld [vmem:[%s3318_s3 + $0x540] sm:$0xff]  ;;  %v793_v24 = vld [vmem:[%s3318_s3 + $0x358] sm:$0xff] }
  0x8a   :  { %1059 = vmatprep.subr.mxu0 %v704_v26  ;;  %935 = vmatprep.subr.mxu1 %v817_v30  ;;  %v789_v26 = vld [vmem:[%s3318_s3 + $0x338] sm:$0xff]  ;;  %v848_v30 = vld [vmem:[%s3318_s3 + $0x510] sm:$0xff] }
  0x8b   :  { %1060 = vmatpush1.msra.mxu0 %v703_v29  ;;  %936 = vmatpush2.msra.mxu1 %v816_v32  ;;  %v849_v27 = vld [vmem:[%s3318_s3 + $0x518] sm:$0xff]  ;;  %v788_v29 = vld [vmem:[%s3318_s3 + $0x330] sm:$0xff] }
  0x8c   :  { %1061 = vmatprep.subr.mxu0 %v699_v31  ;;  %937 = vmatprep.subr.mxu1 %v812_v34  ;;  %v784_v31 = vld [vmem:[%s3318_s3 + $0x310] sm:$0xff]  ;;  %v845_v32 = vld [vmem:[%s3318_s3 + $0x4f8] sm:$0xff] }
  0x8d   :  { %1062 = vmatpush1.msra.mxu0 %v698_v33  ;;  %938 = vmatpush2.msra.mxu1 %v811_v36  ;;  %v783_v33 = vld [vmem:[%s3318_s3 + $0x308] sm:$0xff]  ;;  %v765_v34 = vld [vmem:[%s3318_s3 + $0x278] sm:$0xff]  ;;  %v840_v36 = vld [vmem:[%s3318_s3 + $0x4d0] sm:$0xff] }
  0x8e   :  { %1063 = vmatprep.subr.mxu0 %v694_v35  ;;  %939 = vmatprep.subr.mxu1 %v807_v38  ;;  %v779_v35 = vld [vmem:[%s3318_s3 + $0x2e8] sm:$0xff]  ;;  %v760_v38 = vld [vmem:[%s3318_s3 + $0x250] sm:$0xff] }
  0x8f   :  { %1064 = vmatpush1.msra.mxu0 %v693_v37  ;;  %940 = vmatpush2.msra.mxu1 %v806_v40  ;;  %v778_v37 = vld [vmem:[%s3318_s3 + $0x2e0] sm:$0xff]  ;;  %v835_v40 = vld [vmem:[%s3318_s3 + $0x4a8] sm:$0xff] }
  0x90   :  { %1065 = vmatprep.subr.mxu0 %v689_v39  ;;  %941 = vmatprep.subr.mxu1 %v802_v42  ;;  %v774_v39 = vld [vmem:[%s3318_s3 + $0x2c0] sm:$0xff]  ;;  %v755_v42 = vld [vmem:[%s3318_s3 + $0x228] sm:$0xff] }
  0x91   :  { %1066 = vmatpush1.msra.mxu0 %v688_v41  ;;  %942 = vmatpush2.msra.mxu1 %v801_v44  ;;  %v773_v41 = vld [vmem:[%s3318_s3 + $0x2b8] sm:$0xff]  ;;  %v830_v44 = vld [vmem:[%s3318_s3 + $0x480] sm:$0xff] }
  0x92   :  { %1067 = vmatprep.subr.mxu0 %v844_v43  ;;  %943 = vmatprep.subr.mxu1 %v797_v46  ;;  %v769_v43 = vld [vmem:[%s3318_s3 + $0x298] sm:$0xff]  ;;  %v750_v46 = vld [vmem:[%s3318_s3 + $0x200] sm:$0xff] }
  0x93   :  { %1068 = vmatpush2.msra.mxu0 %v843_v45  ;;  %944 = vmatpush2.msra.mxu1 %v796_v48  ;;  %v768_v45 = vld [vmem:[%s3318_s3 + $0x290] sm:$0xff]  ;;  %v745_v48 = vld [vmem:[%s3318_s3 + $0x1d8] sm:$0xff] }
  0x94   :  { %1069 = vmatprep.subr.mxu0 %v839_v47  ;;  %945 = vmatprep.subr.mxu1 %v792_v50  ;;  %v825_v47 = vld [vmem:[%s3318_s3 + $0x458] sm:$0xff] }
  0x95   :  { %1070 = vmatpush2.msra.mxu0 %v838_v49  ;;  %946 = vmatpush2.msra.mxu1 %v791_v52  ;;  %v820_v49 = vld [vmem:[%s3318_s3 + $0x430] sm:$0xff]  ;;  %v865_v50 = vld [vmem:[%s3318_s3 + $0x598] sm:$0xff]  ;;  %v815_v52 = vld [vmem:[%s3318_s3 + $0x408] sm:$0xff] }
  0x96   :  { %1071 = vmatprep.subr.mxu0 %v834_v51  ;;  %947 = vmatprep.subr.mxu1 %v787_v54  ;;  %v740_v51 = vld [vmem:[%s3318_s3 + $0x1b0] sm:$0xff] }
  0x97   :  { %1072 = vmatpush2.msra.mxu0 %v833_v53  ;;  %948 = vmatpush2.msra.mxu1 %v786_v56  ;;  %v735_v53 = vld [vmem:[%s3318_s3 + $0x188] sm:$0xff]  ;;  %v860_v54 = vld [vmem:[%s3318_s3 + $0x570] sm:$0xff]  ;;  %v730_v56 = vld [vmem:[%s3318_s3 + $0x160] sm:$0xff] }
  0x98   :  { %1073 = vmatprep.subr.mxu0 %v829_v55  ;;  %949 = vmatprep.subr.mxu1 %v782_v58  ;;  %v810_v55 = vld [vmem:[%s3318_s3 + $0x3e0] sm:$0xff]  ;;  %v805_v58 = vld [vmem:[%s3318_s3 + $0x3b8] sm:$0xff] }
  0x99   :  { %1074 = vmatpush2.msra.mxu0 %v828_v57  ;;  %950 = vmatpush2.msra.mxu1 %v781_v60  ;;  %v855_v57 = vld [vmem:[%s3318_s3 + $0x548] sm:$0xff]  ;;  %v800_v60 = vld [vmem:[%s3318_s3 + $0x390] sm:$0xff] }
  0x9a   :  { %1075 = vmatprep.subr.mxu0 %v824_v59  ;;  %951 = vmatprep.subr.mxu1 %v777_v62  ;;  %v725_v59 = vld [vmem:[%s3318_s3 + $0x138] sm:$0xff]  ;;  %v795_v62 = vld [vmem:[%s3318_s3 + $0x368] sm:$0xff] }
  0x9b   :  { %1076 = vmatpush2.msra.mxu0 %v823_v61  ;;  %952 = vmatpush2.msra.mxu1 %v776_v0  ;;  %v720_v61 = vld [vmem:[%s3318_s3 + $0x110] sm:$0xff]  ;;  %v715_v0 = vld [vmem:[%s3318_s3 + $0xe8] sm:$0xff] }
  0x9c   :  { %1077 = vmatprep.subr.mxu0 %v819_v63  ;;  %953 = vmatprep.subr.mxu1 %v772_v2  ;;  %v1353_v63 = vld [vmem:[%s3319_s5 + $0xf8] sm:$0xff]  ;;  %v790_v2 = vld [vmem:[%s3318_s3 + $0x340] sm:$0xff] }
  0x9d   :  { %1078 = vmatpush2.msra.mxu0 %v818_v1  ;;  %954 = vmatpush2.msra.mxu1 %v771_v6  ;;  %v1337_v1 = vld [vmem:[%s3319_s5 + $0x78] sm:$0xff]  ;;  %v710_v6 = vld [vmem:[%s3318_s3 + $0xc0] sm:$0xff] }
  0x9e   :  { %1079 = vmatprep.subr.mxu0 %v814_v3  ;;  %955 = vmatprep.subr.mxu1 %v767_v8  ;;  %v1352_v3 = vld [vmem:[%s3319_s5 + $0xf0] sm:$0xff]  ;;  %v785_v8 = vld [vmem:[%s3318_s3 + $0x318] sm:$0xff] }
  0x9f   :  { %1080 = vmatpush2.msra.mxu0 %v813_v7  ;;  %956 = vmatpush2.msra.mxu1 %v766_v23  ;;  %v1336_v7 = vld [vmem:[%s3319_s5 + $0x70] sm:$0xff]  ;;  %v1335_v23 = vld [vmem:[%s3319_s5 + $0x68] sm:$0xff] }
  0xa0   :  { %1081 = vmatprep.subr.mxu0 %v809_v20  ;;  %957 = vmatprep.mubr.f32.mxu1 %v2303_v15  ;;  %v705_v20 = vld [vmem:[%s3318_s3 + $0x98] sm:$0xff] }
  0xa1   :  { %1082 = vmatpush2.msra.mxu0 %v808_v9  ;;  %958 = vmatmul.mubr.f32.vlgmr.msra.gmra.mxu1 %v2269_v5  ;;  %v780_v9 = vld [vmem:[%s3318_s3 + $0x2f0] sm:$0xff] }
  0xa2   :  { %1083 = vmatprep.subr.mxu0 %v804_v11  ;;  %1130 = vmatprep.subr.mxu1 %v864_v12  ;;  %v1350_v11 = vld [vmem:[%s3319_s5 + $0xe0] sm:$0xff]  ;;  %v700_v12 = vld [vmem:[%s3318_s3 + $0x70] sm:$0xff] }
  0xa3   :  { %1084 = vmatpush2.msra.mxu0 %v803_v13  ;;  %1131 = vmatpush1.msra.mxu1 %v863_v14  ;;  %v1334_v13 = vld [vmem:[%s3319_s5 + $0x60] sm:$0xff]  ;;  %v775_v14 = vld [vmem:[%s3318_s3 + $0x2c8] sm:$0xff] }
  0xa4   :  { %1085 = vmatprep.subr.mxu0 %v799_v16  ;;  %1132 = vmatprep.subr.mxu1 %v859_v17  ;;  %v1349_v16 = vld [vmem:[%s3319_s5 + $0xd8] sm:$0xff]  ;;  %v695_v17 = vld [vmem:[%s3318_s3 + $0x48] sm:$0xff] }
  0xa5   :  { %1086 = vmatpush2.msra.mxu0 %v798_v18  ;;  %1133 = vmatpush1.msra.mxu1 %v858_v19  ;;  %v1333_v18 = vld [vmem:[%s3319_s5 + $0x58] sm:$0xff]  ;;  %v770_v19 = vld [vmem:[%s3318_s3 + $0x2a0] sm:$0xff] }
  0xa6   :  { %1087 = vmatprep.subr.mxu0 %v794_v21  ;;  %1134 = vmatprep.subr.mxu1 %v854_v22  ;;  %v1348_v21 = vld [vmem:[%s3319_s5 + $0xd0] sm:$0xff]  ;;  %v690_v22 = vld [vmem:[%s3318_s3 + $0x20] sm:$0xff] }
  0xa7   :  { %1088 = vmatpush2.msra.mxu0 %v793_v24  ;;  %1135 = vmatpush1.msra.mxu1 %v853_v25  ;;  %v1332_v24 = vld [vmem:[%s3319_s5 + $0x50] sm:$0xff]  ;;  %v1347_v25 = vld [vmem:[%s3319_s5 + $0xc8] sm:$0xff] }
  0xa8   :  { %1089 = vmatprep.subr.mxu0 %v789_v26  ;;  %1136 = vmatprep.subr.mxu1 %v849_v27  ;;  %v1331_v26 = vld [vmem:[%s3319_s5 + $0x48] sm:$0xff]  ;;  %v1385_v27 = vld [vmem:[%s3319_s5 + $0x1f8] sm:$0xff] }
  0xa9   :  { %1090 = vmatpush2.msra.mxu0 %v788_v29  ;;  %1137 = vmatpush1.msra.mxu1 %v848_v30  ;;  %v1346_v29 = vld [vmem:[%s3319_s5 + $0xc0] sm:$0xff]  ;;  %v1369_v30 = vld [vmem:[%s3319_s5 + $0x178] sm:$0xff] }
  0xaa   :  { %1170 = vmatprep.mubr.f32.mxu1 %v1845_v4  ;;  %1091 = vmatprep.subr.mxu0 %v784_v31  ;;  %v1330_v31 = vld [vmem:[%s3319_s5 + $0x40] sm:$0xff] }
  0xab   :  { %1636 = vmatmul.mubr.msk.f32.vlgmr.msra.gmra.mxu1 %vm259_vm0, %v1969_v28  ;;  %1681 = vmatprep.subr.mxu1 %v845_v32  ;;  %v1384_v32 = vld [vmem:[%s3319_s5 + $0x1f0] sm:$0xff] }
  0xac   :  { %1092 = vmatpush2.msra.mxu0 %v783_v33  ;;  %1682 = vmatpush3.msra.mxu1 %v765_v34  ;;  %v1345_v33 = vld [vmem:[%s3319_s5 + $0xb8] sm:$0xff]  ;;  %v1368_v34 = vld [vmem:[%s3319_s5 + $0x170] sm:$0xff] }
  0xad   :  { %1093 = vmatprep.subr.mxu0 %v779_v35  ;;  %1683 = vmatprep.subr.mxu1 %v840_v36  ;;  %v1383_v35 = vld [vmem:[%s3319_s5 + $0x1e8] sm:$0xff]  ;;  %v1344_v36 = vld [vmem:[%s3319_s5 + $0xb0] sm:$0xff] }
  0xae   :  { %1094 = vmatpush2.msra.mxu0 %v778_v37  ;;  %1684 = vmatpush3.msra.mxu1 %v760_v38  ;;  %v1367_v37 = vld [vmem:[%s3319_s5 + $0x168] sm:$0xff]  ;;  %v1328_v38 = vld [vmem:[%s3319_s5 + $0x30] sm:$0xff] }
  0xaf   :  { %1095 = vmatprep.subr.mxu0 %v774_v39  ;;  %1685 = vmatprep.subr.mxu1 %v835_v40  ;;  %v1343_v39 = vld [vmem:[%s3319_s5 + $0xa8] sm:$0xff] }
  0xb0   :  { %1096 = vmatpush2.msra.mxu0 %v773_v41  ;;  %1686 = vmatpush3.msra.mxu1 %v755_v42  ;;  %v1327_v40 = vld [vmem:[%s3319_s5 + $0x28] sm:$0xff]  ;;  %v1342_v41 = vld [vmem:[%s3319_s5 + $0xa0] sm:$0xff] }
  0xb1   :  { %1097 = vmatprep.subr.mxu0 %v769_v43  ;;  %1687 = vmatprep.subr.mxu1 %v830_v44  ;;  %v1382_v42 = vld [vmem:[%s3319_s5 + $0x1e0] sm:$0xff] }
  0xb2   :  { %1098 = vmatpush2.msra.mxu0 %v768_v45  ;;  %1099 = vmatprep.mubr.f32.mxu0 %v2303_v15  ;;  %v1326_v43 = vld [vmem:[%s3319_s5 + $0x20] sm:$0xff]  ;;  %v1341_v45 = vld [vmem:[%s3319_s5 + $0x98] sm:$0xff] }
  0xb3   :  { %1688 = vmatpush3.msra.mxu1 %v750_v46  ;;  %1100 = vmatmul.mubr.f32.vlgmr.msra.gmra.mxu0 %v2269_v5  ;;  %v1366_v44 = vld [vmem:[%s3319_s5 + $0x160] sm:$0xff]  ;;  %v1381_v46 = vld [vmem:[%s3319_s5 + $0x1d8] sm:$0xff] }
  0xb4   :  { %1689 = vmatprep.subr.mxu1 %v825_v47  ;;  %1811 = vmatprep.subr.mxu0 %v1845_v4  ;;  %v1325_v47 = vld [vmem:[%s3319_s5 + $0x18] sm:$0xff] }
  0xb5   :  { %1690 = vmatpush3.msra.mxu1 %v745_v48  ;;  %1812 = vmatpush3.msra.mxu0 %v865_v50  ;;  %v1365_v48 = vld [vmem:[%s3319_s5 + $0x158] sm:$0xff]  ;;  %v1380_v50 = vld [vmem:[%s3319_s5 + $0x1d0] sm:$0xff] }
  0xb6   :  { %1691 = vmatprep.subr.mxu1 %v820_v49  ;;  %1813 = vmatprep.subr.mxu0 %v1845_v4  ;;  %v1340_v49 = vld [vmem:[%s3319_s5 + $0x90] sm:$0xff] }
  0xb7   :  { %1692 = vmatpush3.msra.mxu1 %v740_v51  ;;  %1241 = vmatprep.mubr.f32.mxu1 %v2303_v15  ;;  %v850_v15 = vld [vmem:[%s3318_s3 + $0x520] sm:$0xff]  ;;  %v1324_v51 = vld [vmem:[%s3319_s5 + $0x10] sm:$0xff] }
  0xb8   :  { %1693 = vmatprep.subr.mxu1 %v815_v52  ;;  %1814 = vmatpush3.msra.mxu0 %v860_v54  ;;  %v1364_v52 = vld [vmem:[%s3319_s5 + $0x150] sm:$0xff]  ;;  %v1379_v54 = vld [vmem:[%s3319_s5 + $0x1c8] sm:$0xff] }
  0xb9   :  { %1694 = vmatpush3.msra.mxu1 %v735_v53  ;;  %1815 = vmatprep.subr.mxu0 %v1845_v4  ;;  %v1339_v53 = vld [vmem:[%s3319_s5 + $0x88] sm:$0xff] }
  0xba   :  { %1695 = vmatprep.subr.mxu1 %v810_v55  ;;  %1816 = vmatpush3.msra.mxu0 %v855_v57  ;;  %v1323_v55 = vld [vmem:[%s3319_s5 + $0x8] sm:$0xff]  ;;  %v1338_v57 = vld [vmem:[%s3319_s5 + $0x80] sm:$0xff] }
  0xbb   :  { %1696 = vmatpush3.msra.mxu1 %v730_v56  ;;  %1817 = vmatprep.subr.mxu0 %v1845_v4  ;;  %v1363_v56 = vld [vmem:[%s3319_s5 + $0x148] sm:$0xff] }
  0xbc   :  { %1697 = vmatprep.subr.mxu1 %v805_v58  ;;  %1818 = vmatpush3.msra.mxu0 %v850_v15  ;;  %v1378_v58 = vld [vmem:[%s3319_s5 + $0x1c0] sm:$0xff] }
  0xbd   :  { %1698 = vmatpush3.msra.mxu1 %v725_v59  ;;  %1819 = vmatprep.mubr.msk.f32.mxu0 %vm1847_vm1, %v1845_v4  ;;  %v1322_v59 = vld [vmem:[%s3319_s5] sm:$0xff] }
  0xbe   :  { %1699 = vmatprep.subr.mxu1 %v800_v60  ;;  %1820 = vmatmul.mubr.msk.f32.vlgmr.msra.gmra.mxu0 %vm259_vm0, %v1969_v28  ;;  %v1351_v28 = vld [vmem:[%s3319_s5 + $0xe8] sm:$0xff]  ;;  %v1362_v15 = vld [vmem:[%s3319_s5 + $0x140] sm:$0xff]  ;;  %v1377_v60 = vld [vmem:[%s3319_s5 + $0x1b8] sm:$0xff] }
  0xbf   :  { %1700 = vmatpush3.msra.mxu1 %v720_v61  ;;  %1721 = vmatprep.subr.mxu0 %v1353_v63  ;;  %v1361_v61 = vld [vmem:[%s3319_s5 + $0x138] sm:$0xff]  ;;  %v1360_v63 = vld [vmem:[%s3319_s5 + $0x130] sm:$0xff] }
  0xc0   :  { %1701 = vmatprep.subr.mxu1 %v795_v62  ;;  %1722 = vmatpush3.msra.mxu0 %v1337_v1  ;;  %v1376_v62 = vld [vmem:[%s3319_s5 + $0x1b0] sm:$0xff]  ;;  %v1359_v1 = vld [vmem:[%s3319_s5 + $0x128] sm:$0xff] }
  0xc1   :  { %1702 = vmatpush3.msra.mxu1 %v715_v0  ;;  %1723 = vmatprep.subr.mxu0 %v1352_v3  ;;  %v1375_v0 = vld [vmem:[%s3319_s5 + $0x1a8] sm:$0xff]  ;;  %v1358_v3 = vld [vmem:[%s3319_s5 + $0x120] sm:$0xff] }
  0xc2   :  { %1703 = vmatprep.subr.mxu1 %v790_v2  ;;  %1724 = vmatpush3.msra.mxu0 %v1336_v7  ;;  %v1374_v2 = vld [vmem:[%s3319_s5 + $0x1a0] sm:$0xff]  ;;  %v1357_v7 = vld [vmem:[%s3319_s5 + $0x118] sm:$0xff] }
  0xc3   :  { %1704 = vmatpush3.msra.mxu1 %v710_v6  ;;  %1725 = vmatprep.subr.mxu0 %v1351_v28  ;;  %v1373_v6 = vld [vmem:[%s3319_s5 + $0x198] sm:$0xff]  ;;  %v1356_v28 = vld [vmem:[%s3319_s5 + $0x110] sm:$0xff] }
  0xc4   :  { %1705 = vmatprep.subr.mxu1 %v785_v8  ;;  %1726 = vmatpush3.msra.mxu0 %v1335_v23  ;;  %v1372_v8 = vld [vmem:[%s3319_s5 + $0x190] sm:$0xff]  ;;  %v1355_v23 = vld [vmem:[%s3319_s5 + $0x108] sm:$0xff] }
  0xc5   :  { %1706 = vmatpush3.msra.mxu1 %v705_v20  ;;  %1727 = vmatprep.subr.mxu0 %v1350_v11  ;;  %v1371_v20 = vld [vmem:[%s3319_s5 + $0x188] sm:$0xff]  ;;  %v1354_v11 = vld [vmem:[%s3319_s5 + $0x100] sm:$0xff] }
  0xc6   :  { %1707 = vmatprep.subr.mxu1 %v780_v9  ;;  %1728 = vmatpush3.msra.mxu0 %v1334_v13  ;;  %v1370_v9 = vld [vmem:[%s3319_s5 + $0x180] sm:$0xff]  ;;  %v225_v13 = vsub.s32 2, %v1917_v10 }
  0xc7   :  { %1708 = vmatpush3.msra.mxu1 %v700_v12  ;;  %1729 = vmatprep.subr.mxu0 %v1349_v16  ;;  %v229_v16 = vsub.s32 3, %v1917_v10 }
  0xc8   :  { %1709 = vmatprep.subr.mxu1 %v775_v14  ;;  %1730 = vmatpush3.msra.mxu0 %v1333_v18 }
  0xc9   :  { %1710 = vmatpush3.msra.mxu1 %v695_v17  ;;  %1731 = vmatprep.subr.mxu0 %v1348_v21  ;;  %v3239_v17 = vld [vmem:[%s3320_s2] sm:$0x1f] }
  0xca   :  { %1711 = vmatprep.subr.mxu1 %v770_v19  ;;  %1732 = vmatpush3.msra.mxu0 %v1332_v24  ;;  %v226_v19 = vrot.slane %v3239_v17, %v225_v13  ;;  %v230_v21 = vrot.slane %v3239_v17, %v229_v16 }
  0xcb   :  { %1712 = vmatpush3.msra.mxu1 %v690_v22  ;;  %1733 = vmatprep.subr.mxu0 %v1347_v25 }
  0xcc   :  { %1242 = vmatmul.mubr.f32.vlgmr.msra.gmra.mxu1 %v2269_v5  ;;  %1734 = vmatpush3.msra.mxu0 %v1331_v26  ;;  %v1329_v5 = vld [vmem:[%s3319_s5 + $0x38] sm:$0xff]  ;;  %v399_v12 = vpop.f32.mrf.mxu1 }
  0xcd   :  { %1756 = vmatprep.subr.mxu1 %v1385_v27  ;;  %1735 = vmatprep.subr.mxu0 %v1346_v29 }
  0xce   :  { %1757 = vmatpush3.msra.mxu1 %v1369_v30  ;;  %1736 = vmatpush3.msra.mxu0 %v1330_v31  ;;  %v401_v14 = vpop.f32.mrf.mxu1 }
  0xcf   :  { %1758 = vmatprep.subr.mxu1 %v1384_v32  ;;  %1737 = vmatprep.subr.mxu0 %v1345_v33 }
  0xd0   :  { %1759 = vmatpush3.msra.mxu1 %v1368_v34  ;;  %1738 = vmatpush3.msra.mxu0 %v1329_v5  ;;  %v221_v5 = vsub.s32 1, %v1917_v10 }
  0xd1   :  { %1760 = vmatprep.subr.mxu1 %v1383_v35  ;;  %1739 = vmatprep.subr.mxu0 %v1344_v36  ;;  %v217_v35 = vsub.s32 0, %v1917_v10 }
  0xd2   :  { %1761 = vmatpush3.msra.mxu1 %v1367_v37  ;;  %1740 = vmatpush3.msra.mxu0 %v1328_v38  ;;  %v3256_v37 = vld [vmem:[%s3321_s4] sm:$0x1f]  ;;  %v222_v38 = vrot.slane %v3239_v17, %v221_v5 }
  0xd3   :  { %1741 = vmatprep.subr.mxu0 %v1343_v39  ;;  %1762 = vmatprep.subr.mxu1 %v1382_v42  ;;  %v871_v39 = vrot.slane %v3256_v37, %v217_v35  ;;  %v875_v42 = vrot.slane %v3256_v37, %v221_v5  ;;  %v1638_v5 = vld [vmem:[%s3323_s6] ss:$0 sm:$0xff] }
  0xd4   :  { %1742 = vmatpush3.msra.mxu0 %v1327_v40  ;;  %1763 = vmatpush3.msra.mxu1 %v1366_v44  ;;  %v218_v40 = vrot.slane %v3239_v17, %v217_v35 }
  0xd5   :  { %1743 = vmatprep.subr.mxu0 %v1342_v41  ;;  %1764 = vmatprep.subr.mxu1 %v1381_v46 }
  0xd6   :  { %1744 = vmatpush3.msra.mxu0 %v1326_v43  ;;  %1765 = vmatpush3.msra.mxu1 %v1365_v48 }
  0xd7   :  { %1745 = vmatprep.subr.mxu0 %v1341_v45  ;;  %1766 = vmatprep.subr.mxu1 %v1380_v50 }
  0xd8   :  { %1746 = vmatpush3.msra.mxu0 %v1325_v47  ;;  %1767 = vmatpush3.msra.mxu1 %v1364_v52 }
  0xd9   :  { %1747 = vmatprep.subr.mxu0 %v1340_v49  ;;  %1768 = vmatprep.subr.mxu1 %v1379_v54 }
  0xda   :  { %1748 = vmatpush3.msra.mxu0 %v1324_v51  ;;  %1769 = vmatpush3.msra.mxu1 %v1363_v56 }
  0xdb   :  { %1749 = vmatprep.subr.mxu0 %v1339_v53  ;;  %1770 = vmatprep.subr.mxu1 %v1378_v58  ;;  %v1392_v58 = vld [vmem:[%s3319_s5 + $0x230] sm:$0xff] }
  0xdc   :  { %1750 = vmatpush3.msra.mxu0 %v1323_v55  ;;  %1771 = vmatpush3.msra.mxu1 %v1362_v15  ;;  %v1390_v15 = vld [vmem:[%s3319_s5 + $0x220] sm:$0xff] }
  0xdd   :  { %1751 = vmatprep.subr.mxu0 %v1338_v57  ;;  %1772 = vmatprep.subr.mxu1 %v1377_v60  ;;  %v1393_v57 = vld [vmem:[%s3319_s5 + $0x238] sm:$0xff]  ;;  %v879_v60 = vrot.slane %v3256_v37, %v225_v13 }
  0xde   :  { %1752 = vmatpush3.msra.mxu0 %v1322_v59  ;;  %1773 = vmatpush3.msra.mxu1 %v1361_v61  ;;  %v1391_v59 = vld [vmem:[%s3319_s5 + $0x228] sm:$0xff]  ;;  %v1389_v61 = vld [vmem:[%s3319_s5 + $0x218] sm:$0xff] }
  0xdf   :  { %1822 = vmatprep.subr.mxu0 %v1845_v4  ;;  %1774 = vmatprep.subr.mxu1 %v1376_v62  ;;  %v883_v62 = vrot.slane %v3256_v37, %v229_v16 }
  0xe0   :  { %1775 = vmatpush3.msra.mxu1 %v1360_v63 }
  0xe1   :  { %1776 = vmatprep.subr.mxu1 %v1375_v0 }
  0xe2   :  { %1777 = vmatpush3.msra.mxu1 %v1359_v1  ;;  %v1388_v1 = vld [vmem:[%s3319_s5 + $0x210] sm:$0xff] }
  0xe3   :  { %1778 = vmatprep.subr.mxu1 %v1374_v2 }
  0xe4   :  { %1779 = vmatpush3.msra.mxu1 %v1358_v3 }
  0xe5   :  { %1780 = vmatprep.subr.mxu1 %v1373_v6  ;;  %v1387_v6 = vld [vmem:[%s3319_s5 + $0x208] sm:$0xff] }
  0xe6   :  { %1781 = vmatpush3.msra.mxu1 %v1357_v7 }
  0xe7   :  { %1782 = vmatprep.subr.mxu1 %v1372_v8 }
  0xe8   :  { %1783 = vmatpush3.msra.mxu1 %v1356_v28 }
  0xe9   :  { %1784 = vmatprep.subr.mxu1 %v1371_v20  ;;  %v1386_v20 = vld [vmem:[%s3319_s5 + $0x200] sm:$0xff] }
  0xea   :  { %1785 = vmatpush3.msra.mxu1 %v1355_v23 }
  0xeb   :  { %1786 = vmatprep.subr.mxu1 %v1370_v9 }
  0xec   :  { %1787 = vmatpush3.msra.mxu1 %v1354_v11 }
 0x103   :  { %v328_v33 = vpop.f32.mrf.mxu0 }
 0x104   :  { %v329_v47 = vadd.f32 %v328_v33, %v218_v40  ;;  %v1640_v40 = vld [vmem:[%s3324_s8] ss:$0 sm:$0xff] }
 0x105   :  { %v330_v34 = vpop.f32.mrf.mxu0 }
 0x106   :  { %v331_v45 = vadd.f32 %v330_v34, %v222_v38  ;;  %v400_v54 = vadd.f32 %v399_v12, %v329_v47  ;;  %v1615_v34 = vld [vmem:[%s3322_s7] sm:$0x3] }
 0x108   :  { %v402_v52 = vadd.f32 %v401_v14, %v331_v45  ;;  %v233_v14 = vsub.s32 4, %v1917_v10 }
 0x10a   :  { %v234_v16 = vrot.slane %v3239_v17, %v233_v14 }
 0x10c   :  { %v470_v18 = vpop.f32.mrf.mxu1 }
 0x10d   :  { %v471_v24 = vadd.f32 %v470_v18, %v226_v19 }
 0x10e   :  { %v472_v22 = vpop.f32.mrf.mxu1 }
 0x10f   :  { %v473_v26 = vadd.f32 %v472_v22, %v230_v21  ;;  %v887_v21 = vrot.slane %v3256_v37, %v233_v14 }
 0x115   :  { %v541_v25 = vpop.f32.mrf.mxu1 }
 0x116   :  { %v3243_v27 = vadd.f32 %v541_v25, %v471_v24 }
 0x117   :  { %v543_v29 = vpop.f32.mrf.mxu1 }
 0x118   :  { %v3245_v30 = vadd.f32 %v543_v29, %v473_v26 }
 0x11f   :  { %v3247_v31 = vpop.f32.mrf.mxu1 }
 0x121   :  { %v1810_v32 = vpop.f32.mrf.mxu1 }
 0x127   :  { %v3251_v36 = vpop.f32.mrf.mxu0 }
 0x129   :  { %v1674_v41 = vpop.f32.mrf.mxu0 }
 0x12a   :  { %v1675_v18 = vadd.f32 %v1674_v41, %v3251_v36  ;;  %v1616_v36 = vand.u32 2147483647, %v1615_v34 }
 0x12c   :  { %vm1617_vm3 = vcmp.gt.f32.partialorder %v1616_v36, 1e-07 }
 0x132   :  { %v1030_v43 = vpop.f32.mrf.mxu0 }
 0x134   :  { %v1032_v50 = vpop.f32.mrf.mxu0 }
 0x161   :  { %v959_v44 = vpop.f32.mrf.mxu1 }
 0x162   :  { %v960_v46 = vadd.f32 %v959_v44, %v871_v39 }
 0x163   :  { %v961_v48 = vpop.f32.mrf.mxu1 }
 0x164   :  { %v962_v49 = vadd.f32 %v961_v48, %v875_v42  ;;  %v1031_v51 = vadd.f32 %v1030_v43, %v960_v46 }
 0x166   :  { %v1033_v53 = vadd.f32 %v1032_v50, %v962_v49  ;;  %v1317_v56 = vmul.f32 %v1031_v51, %v400_v54 }
 0x168   :  { %v1318_v55 = vmul.f32 %v1033_v53, %v402_v52 }
 0x16a   :  { %1469 = vmatprep.mubr.f32.mxu0 %v1318_v55 }
 0x16b   :  { %1470 = vmatmul.mubr.f32.vlgmr.msra.gmra.mxu0 %v1317_v56  ;;  %v1172_v63 = vpop.f32.mrf.mxu1 }
 0x16c   :  { %1823 = vmatpush3.msra.mxu0 %v1393_v57  ;;  %1838 = vmatprep.mubr.msk.f32.mxu0 %vm1847_vm1, %v1845_v4 }
 0x16d   :  { %1824 = vmatprep.subr.mxu0 %v1845_v4  ;;  %v1174_v8 = vpop.f32.mrf.mxu1 }
 0x16e   :  { %1825 = vmatpush3.msra.mxu0 %v1392_v58 }
 0x16f   :  { %1826 = vmatprep.subr.mxu0 %v1845_v4 }
 0x170   :  { %1827 = vmatpush3.msra.mxu0 %v1391_v59 }
 0x171   :  { %1828 = vmatprep.subr.mxu0 %v1845_v4 }
 0x172   :  { %1829 = vmatpush3.msra.mxu0 %v1390_v15 }
 0x173   :  { %v1101_v0 = vpop.f32.mrf.mxu0  ;;  %1830 = vmatprep.subr.mxu0 %v1845_v4 }
 0x174   :  { %v1102_v2 = vadd.f32 %v1101_v0, %v879_v60  ;;  %1831 = vmatpush3.msra.mxu0 %v1389_v61 }
 0x175   :  { %v1103_v3 = vpop.f32.mrf.mxu0  ;;  %1832 = vmatprep.subr.mxu0 %v1845_v4 }
 0x176   :  { %v1104_v7 = vadd.f32 %v1103_v3, %v883_v62  ;;  %1833 = vmatpush3.msra.mxu0 %v1388_v1  ;;  %v1173_v28 = vadd.f32 %v1172_v63, %v1102_v2 }
 0x177   :  { %1834 = vmatprep.subr.mxu0 %v1845_v4 }
 0x178   :  { %v1175_v23 = vadd.f32 %v1174_v8, %v1104_v7  ;;  %1835 = vmatpush3.msra.mxu0 %v1387_v6  ;;  %v1319_v11 = vmul.f32 %v1173_v28, %v3243_v27 }
 0x179   :  { %1836 = vmatprep.subr.mxu0 %v1845_v4  ;;  %v613_v4 = vadd.f32 %v1675_v18, %v234_v16 }
 0x17a   :  { %v1320_v9 = vmul.f32 %v1175_v23, %v3245_v30  ;;  %1837 = vmatpush3.msra.mxu0 %v1386_v20 }
 0x17b   :  { %v683_v26 = vadd.f32 %v3247_v31, %v613_v4 }
 0x17c   :  { %1539 = vmatprep.mubr.f32.mxu1 %v1320_v9 }
 0x17d   :  { %1540 = vmatmul.mubr.f32.vlgmr.msra.gmra.mxu1 %v1319_v11 }
 0x17e   :  { %v1313_v12 = vpop.f32.mrf.mxu0 }
 0x180   :  { %v1821_v13 = vpop.f32.mrf.mxu0 }
 0x18c   :  { %v1713_v19 = vpop.f32.mrf.mxu1 }
 0x18e   :  { %v1714_v22 = vpop.f32.mrf.mxu1 }
 0x18f   :  { %v1715_v24 = vadd.f32 %v1714_v22, %v1713_v19 }
 0x191   :  { %v1244_v25 = vadd.f32 %v1715_v24, %v887_v21 }
 0x193   :  { %v1314_v27 = vadd.f32 %v1313_v12, %v1244_v25 }
 0x195   :  { %v1321_v29 = vmul.f32 %v1314_v27, %v683_v26 }
 0x197   :  { %1839 = vmatmul.mubr.msk.f32.vlgmr.msra.gmra.mxu0 %vm1401_vm2, %v1321_v29 }
 0x22b   :  { %v1753_v30 = vpop.f32.mrf.mxu0 }
 0x22d   :  { %v1754_v10 = vpop.f32.mrf.mxu0 }
 0x22e   :  { %v1755_v17 = vadd.f32 %v1754_v10, %v1753_v30 }
 0x230   :  { %v1472_v31 = vadd.f32 %v1755_v17, %v1638_v5 }
 0x23d   :  { %v1788_v32 = vpop.f32.mrf.mxu1 }
 0x23f   :  { %v1789_v33 = vpop.f32.mrf.mxu1 }
 0x240   :  { %v1790_v35 = vadd.f32 %v1789_v33, %v1788_v32 }
 0x242   :  { %v1542_v37 = vadd.f32 %v1790_v35, %v1472_v31 }
 0x257   :  { %v1611_v38 = vpop.f32.mrf.mxu0 }
 0x258   :  { %v1612_v39 = vadd.f32 %v1611_v38, %v1542_v37 }
 0x259   :  { %v1840_v41 = vpop.f32.mrf.mxu0 }
 0x25a   :  { %v1618_v42 = vsel %vm1617_vm3, %v1612_v39, 0.0 }
 0x25b   :  { %v1626_v43 = vadd.f32 %v1640_v40, %v1618_v42 }
 0x25d   :  { %1627 = vst [vmem:[%s3325_s9] sm:$0x3] %v1626_v43 }

</bundles_post_ra>
